<compile_context>
chip_gen: v7x
topology: tpu7x:2x2x1
jax: 0.10.0
libtpu: 0.0.40
codegen_flags: <defaults>
</compile_context>

<pallas_src>
import functools
import math

import jax
import jax.numpy as jnp
import numpy as np
from jax.experimental import pallas as pl
from jax.experimental.pallas import tpu as pltpu


# ----------------------------------------------------------------------------
# Pallas kernel: TB batch elements per grid step, all weights resident in VMEM.
# ----------------------------------------------------------------------------
def _attention_nbeats_kernel(n_layers, num_heads, x_ref, w_ref, b_ref,
                             basis_w_ref, basis_b_ref, theta_ref):
    TB, S, D = x_ref.shape
    H = num_heads
    hd = D // H
    scale = 1.0 / math.sqrt(hd)
    cdt = jnp.bfloat16                                   # MXU operand dtype

    # (TB, S, D) -> (TB*S, D): batch folded into the matmul M dimension.
    h = x_ref[...].reshape(TB * S, D)                    # bf16

    for l in range(n_layers):                            # static unroll over attention layers
        # Lane-aligned per-layer weights: leading-axis indexing only, no lane-offset slices.
        wq, wk, wv, wo = w_ref[l, 0], w_ref[l, 1], w_ref[l, 2], w_ref[l, 3]   # (D, D) bf16
        bq, bk, bv, bo = b_ref[l, 0], b_ref[l, 1], b_ref[l, 2], b_ref[l, 3]   # (1, D) f32

        # Three separate Q/K/V projections: (TB*S, D) x (D, D), f32 accumulation.
        q = (jnp.dot(h, wq, preferred_element_type=jnp.float32) + bq).astype(cdt)
        k = (jnp.dot(h, wk, preferred_element_type=jnp.float32) + bk).astype(cdt)
        v = (jnp.dot(h, wv, preferred_element_type=jnp.float32) + bv).astype(cdt)

        if H == 1:
            q3 = q.reshape(TB, S, D)
            k3 = k.reshape(TB, S, D)
            v3 = v.reshape(TB, S, D)
            s = jnp.einsum("bqd,bkd->bqk", q3, k3,
                           preferred_element_type=jnp.float32) * scale        # (TB, S, S) f32
            s = s - jnp.max(s, axis=-1, keepdims=True)
            p = jnp.exp(s)
            p = p * pl.reciprocal(jnp.sum(p, axis=-1, keepdims=True), approx=True)
            o = jnp.einsum("bqk,bkd->bqd", p.astype(cdt), v3,
                           preferred_element_type=jnp.float32)                # (TB, S, D) f32
        else:
            # (b, h)-batched attention without swapaxes relayouts of the activations.
            q4 = q.reshape(TB, S, H, hd)
            k4 = k.reshape(TB, S, H, hd)
            v4 = v.reshape(TB, S, H, hd)
            s = jnp.einsum("bqhd,bkhd->bhqk", q4, k4,
                           preferred_element_type=jnp.float32) * scale        # (TB, H, S, S)
            s = s - jnp.max(s, axis=-1, keepdims=True)
            p = jnp.exp(s)
            p = p * pl.reciprocal(jnp.sum(p, axis=-1, keepdims=True), approx=True)
            o = jnp.einsum("bhqk,bkhd->bqhd", p.astype(cdt), v4,
                           preferred_element_type=jnp.float32)                # (TB, S, H, hd)

        # Merge heads (free reshape) and out_proj: (TB*S, D) x (D, D); keep h in bf16.
        o = o.reshape(TB * S, D).astype(cdt)
        h = (jnp.dot(o, wo, preferred_element_type=jnp.float32) + bo).astype(cdt)

    # basis_parameters: Linear over the time axis S, batch*feature folded into M.
    # Single repack per grid step (not per layer); the transpose runs on the f32 relayout
    # path, operands go back to bf16 for the MXU.
    y = jnp.swapaxes(h.reshape(TB, S, D).astype(jnp.float32), 1, 2)           # (TB, D, S)
    y = y.reshape(TB * D, S).astype(cdt)                                      # (TB*D, S) bf16
    theta = jnp.dot(y, basis_w_ref[...], preferred_element_type=jnp.float32)
    theta = theta + basis_b_ref[...]                                          # (TB*D, THETA) f32

    # Lane-dense single store; backcast/forecast split happens in the wrapper.
    theta_ref[...] = theta.astype(theta_ref.dtype)


# ----------------------------------------------------------------------------
# Wrapper: host-side layout plumbing, VMEM-aware batch tiling, pallas_call.
# ----------------------------------------------------------------------------
def _round_up(x, m):
    return (x + m - 1) // m * m


def _per_sample_vmem_bytes(S, D, H, theta_size):
    """f32-equivalent upper bound on lane/sublane-padded live intermediates per sample."""
    hd = D // H
    s8 = _round_up(S, 8)
    dl = _round_up(D, 128)
    sl = _round_up(S, 128)
    hdl = _round_up(hd, 128)
    tl = _round_up(theta_size, 128)
    return 4 * (8 * s8 * dl              # h/q/k/v/o working copies + double-buffered x tile
                + 3 * H * s8 * hdl       # per-head q/k/v views
                + 2 * H * s8 * sl        # scores + probs
                + _round_up(D, 8) * tl)  # theta tile


def attention_nbeats_block(x, params, *, num_heads, backcast_size, forecast_size,
                           batch_tile=None):
    """x: (B, D, S).  Returns (backcast (B, D, backcast_size), forecast (B, D, forecast_size))."""
    B, D, S = x.shape
    H = num_heads
    if D % H != 0:
        raise ValueError("input_dim must be divisible by attention_heads")
    theta_size = backcast_size + forecast_size
    n_layers = len(params["in_proj_w"])
    out_dtype = x.dtype

    # ---- one-time host-side layout plumbing: lane-aligned, pre-transposed, bf16 weights ----
    attn_w = jnp.stack([
        jnp.stack([wi[:D].T, wi[D:2 * D].T, wi[2 * D:].T, wo.T])              # (4, D, D)
        for wi, wo in zip(params["in_proj_w"], params["out_proj_w"])
    ]).astype(jnp.bfloat16)                                                   # (L, 4, D, D)
    attn_b = jnp.stack([
        jnp.stack([bi[:D][None, :], bi[D:2 * D][None, :], bi[2 * D:][None, :], bo[None, :]])
        for bi, bo in zip(params["in_proj_b"], params["out_proj_b"])
    ]).astype(jnp.float32)                                                    # (L, 4, 1, D)
    basis_w = params["basis_w"].T.astype(jnp.bfloat16)                        # (S, THETA)
    basis_b = params["basis_b"][None, :].astype(jnp.float32)                  # (1, THETA)
    xt = jnp.transpose(x, (0, 2, 1)).astype(jnp.bfloat16)                     # (B, S, D)

    # ---- VMEM-aware batch tiling with enough grid steps to pipeline / megacore-shard ----
    try:
        vmem_cap = int(pltpu.get_tpu_info().vmem_capacity_bytes)              # 64 MiB/core on v7x
    except Exception:
        vmem_cap = 64 * 2**20                                                 # assume the smallest
    if batch_tile is None:
        budget = min(vmem_cap // 2, 24 * 2**20)                               # headroom for dbuf/spills
        tb_vmem = max(1, budget // _per_sample_vmem_bytes(S, D, H, theta_size))
        tb_grid = max(1, B // 8)          # target >= ~8 grid steps (>=3-4 per v7x TensorCore)
        TB = int(min(tb_vmem, tb_grid, 1024))
    else:
        TB = int(max(1, min(batch_tile, B)))
    TB = _round_up(TB, 8 // math.gcd(8, D))   # keep the (TB*D, THETA) output block sublane-aligned
    B_pad = _round_up(B, TB)                  # pad the batch instead of shrinking TB
    grid = (B_pad // TB,)
    if B_pad != B:
        xt = jnp.pad(xt, ((0, B_pad - B), (0, 0), (0, 0)))

    flops = int(B_pad * (n_layers * (8 * S * D * D + 4 * S * S * D) + 2 * D * S * theta_size))
    transcendentals = int(B_pad * n_layers * H * S * S)
    bytes_accessed = int(sum(int(a.size) * a.dtype.itemsize
                             for a in (xt, attn_w, attn_b, basis_w, basis_b))
                         + B_pad * D * theta_size * jnp.dtype(out_dtype).itemsize)

    kernel = functools.partial(_attention_nbeats_kernel, n_layers, H)

    def run(single_buffer_weights):
        def weight_spec(arr):
            nd = arr.ndim

            def idx(i):
                return (0,) * nd

            if single_buffer_weights:
                # Constant index_map: double-buffering the weights only wastes VMEM.
                return pl.BlockSpec(arr.shape, idx,
                                    pipeline_mode=pl.Buffered(buffer_count=1))
            return pl.BlockSpec(arr.shape, idx)

        call = pl.pallas_call(
            kernel,
            grid=grid,
            in_specs=[pl.BlockSpec((TB, S, D), lambda i: (i, 0, 0)),
                      weight_spec(attn_w), weight_spec(attn_b),
                      weight_spec(basis_w), weight_spec(basis_b)],
            out_specs=pl.BlockSpec((TB * D, theta_size), lambda i: (i, 0)),
            out_shape=jax.ShapeDtypeStruct((B_pad * D, theta_size), out_dtype),
            compiler_params=pltpu.CompilerParams(
                dimension_semantics=("parallel",),
                vmem_limit_bytes=int(min(vmem_cap, 128 * 2**20) * 3 // 4)),
            cost_estimate=pl.CostEstimate(flops=flops, transcendentals=transcendentals,
                                          bytes_accessed=bytes_accessed),
        )
        return call(xt, attn_w, attn_b, basis_w, basis_b)

    try:
        theta = run(single_buffer_weights=True)
    except Exception:
        # pl.Buffered(1) not accepted by this JAX version -> default double-buffering.
        theta = run(single_buffer_weights=False)

    theta = theta.reshape(B_pad, D, theta_size)[:B]
    return theta[..., :backcast_size], theta[..., backcast_size:]


# ----------------------------------------------------------------------------
# Pure-JAX reference (mirrors torch.nn.MultiheadAttention + basis Linear, eval mode, f32).
# ----------------------------------------------------------------------------
def reference_forward(x, params, *, num_heads, backcast_size):
    B, D, S = x.shape
    H = num_heads
    hd = D // H
    h = jnp.transpose(x, (2, 0, 1))                                  # (S, B, D)
    for wi, bi, wo, bo in zip(params["in_proj_w"], params["in_proj_b"],
                              params["out_proj_w"], params["out_proj_b"]):
        qkv = jnp.einsum("sbd,ed->sbe", h, wi) + bi                  # (S, B, 3D)
        q, k, v = qkv[..., :D], qkv[..., D:2 * D], qkv[..., 2 * D:]

        def heads(t):
            return jnp.transpose(t.reshape(S, B * H, hd), (1, 0, 2))  # (B*H, S, hd)

        q, k, v = heads(q), heads(k), heads(v)
        s = jnp.einsum("bqd,bkd->bqk", q, k) / math.sqrt(hd)
        p = jax.nn.softmax(s, axis=-1)
        o = jnp.einsum("bqk,bkd->bqd", p, v)                         # (B*H, S, hd)
        o = jnp.transpose(o, (1, 0, 2)).reshape(S, B, D)
        h = jnp.einsum("sbd,ed->sbe", o, wo) + bo                    # (S, B, D)
    y = jnp.transpose(h, (1, 2, 0))                                  # (B, D, S)
    theta = jnp.einsum("bds,ts->bdt", y, params["basis_w"]) + params["basis_b"]
    return theta[..., :backcast_size], theta[..., backcast_size:]


if __name__ == "__main__":
    # Small, module-consistent sizes.
    B = 16                # batch -> auto tile TB=2, grid=(8,): pipelined + megacore-shardable
    D = 4                 # input_dim (attention embed_dim)
    S = 16                # input_size (attention sequence length)
    H = 1                 # attention_heads (module default)
    N_LAYERS = 2          # attention_layers (multi-layer path exercised)
    F_SZ = 8              # forecast horizon
    THETA = S + F_SZ      # GenericBasis theta_size

    key = jax.random.PRNGKey(0)
    keys = jax.random.split(key, 16)
    ki = iter(keys)

    def rnd(shape, scale=0.1):
        return (scale * jax.random.normal(next(ki), shape)).astype(jnp.float32)

    params = {
        "in_proj_w": [rnd((3 * D, D)) for _ in range(N_LAYERS)],   # torch in_proj_weight
        "in_proj_b": [rnd((3 * D,)) for _ in range(N_LAYERS)],
        "out_proj_w": [rnd((D, D)) for _ in range(N_LAYERS)],      # torch out_proj.weight
        "out_proj_b": [rnd((D,)) for _ in range(N_LAYERS)],
        "basis_w": rnd((THETA, S)),                                # basis_parameters Linear
        "basis_b": rnd((THETA,)),
    }

    x = jax.random.normal(next(ki), (B, D, S), dtype=jnp.float32)

    backcast, forecast = attention_nbeats_block(
        x, params, num_heads=H, backcast_size=S, forecast_size=F_SZ)
    jax.block_until_ready((backcast, forecast))

    ref_back, ref_fore = reference_forward(x, params, num_heads=H, backcast_size=S)
    # bf16 MXU operands inside the kernel vs. an f32 reference -> looser tolerances.
    np.testing.assert_allclose(np.asarray(backcast), np.asarray(ref_back), rtol=2e-2, atol=2e-2)
    np.testing.assert_allclose(np.asarray(forecast), np.asarray(ref_fore), rtol=2e-2, atol=2e-2)

    print("KERNEL_OK")
</pallas_src>

<mosaic_0001>
module attributes {stable_mosaic.version = 11 : i64} {
  func.func @_attention_nbeats_kernel(%arg0: i32, %arg1: memref<2x16x4xbf16, #tpu.memory_space<vmem>>, %arg2: memref<2x4x4x4xbf16, #tpu.memory_space<vmem>>, %arg3: memref<2x4x1x4xf32, #tpu.memory_space<vmem>>, %arg4: memref<16x24xbf16, #tpu.memory_space<vmem>>, %arg5: memref<1x24xf32, #tpu.memory_space<vmem>>, %arg6: memref<8x24xf32, #tpu.memory_space<vmem>>) attributes {dimension_semantics = [#tpu.dimension_semantics<parallel>], iteration_bounds = array<i64: 8>, scalar_prefetch = 0 : i64, scratch_operands = 0 : i64, tpu.core_type = #tpu.core_type<tc>, window_params = [{transform_indices = @transform_0, window_bounds = array<i64: 2, 16, 4>}, {pipeline_mode = #tpu.pipeline_mode<synchronous>, transform_indices = @transform_1, window_bounds = array<i64: 2, 4, 4, 4>}, {pipeline_mode = #tpu.pipeline_mode<synchronous>, transform_indices = @transform_2, window_bounds = array<i64: 2, 4, 1, 4>}, {pipeline_mode = #tpu.pipeline_mode<synchronous>, transform_indices = @transform_3, window_bounds = array<i64: 16, 24>}, {pipeline_mode = #tpu.pipeline_mode<synchronous>, transform_indices = @transform_4, window_bounds = array<i64: 1, 24>}, {transform_indices = @transform_5, window_bounds = array<i64: 8, 24>}]} {
    %c0 = arith.constant 0 : index
    %c0_0 = arith.constant 0 : index
    %c0_1 = arith.constant 0 : index
    %0 = vector.load %arg1[%c0, %c0_0, %c0_1] : memref<2x16x4xbf16, #tpu.memory_space<vmem>>, vector<2x16x4xbf16>
    %1 = vector.shape_cast %0 : vector<2x16x4xbf16> to vector<32x4xbf16>
    %c0_2 = arith.constant 0 : index
    %c0_3 = arith.constant 0 : index
    %c0_4 = arith.constant 0 : index
    %c0_5 = arith.constant 0 : index
    %2 = vector.load %arg2[%c0_2, %c0_3, %c0_4, %c0_5] : memref<2x4x4x4xbf16, #tpu.memory_space<vmem>>, vector<1x1x4x4xbf16>
    %3 = vector.shape_cast %2 : vector<1x1x4x4xbf16> to vector<4x4xbf16>
    %c0_6 = arith.constant 0 : index
    %c1 = arith.constant 1 : index
    %c0_7 = arith.constant 0 : index
    %c0_8 = arith.constant 0 : index
    %4 = vector.load %arg2[%c0_6, %c1, %c0_7, %c0_8] : memref<2x4x4x4xbf16, #tpu.memory_space<vmem>>, vector<1x1x4x4xbf16>
    %5 = vector.shape_cast %4 : vector<1x1x4x4xbf16> to vector<4x4xbf16>
    %c0_9 = arith.constant 0 : index
    %c2 = arith.constant 2 : index
    %c0_10 = arith.constant 0 : index
    %c0_11 = arith.constant 0 : index
    %6 = vector.load %arg2[%c0_9, %c2, %c0_10, %c0_11] : memref<2x4x4x4xbf16, #tpu.memory_space<vmem>>, vector<1x1x4x4xbf16>
    %7 = vector.shape_cast %6 : vector<1x1x4x4xbf16> to vector<4x4xbf16>
    %c0_12 = arith.constant 0 : index
    %c3 = arith.constant 3 : index
    %c0_13 = arith.constant 0 : index
    %c0_14 = arith.constant 0 : index
    %8 = vector.load %arg2[%c0_12, %c3, %c0_13, %c0_14] : memref<2x4x4x4xbf16, #tpu.memory_space<vmem>>, vector<1x1x4x4xbf16>
    %9 = vector.shape_cast %8 : vector<1x1x4x4xbf16> to vector<4x4xbf16>
    %c0_15 = arith.constant 0 : index
    %c0_16 = arith.constant 0 : index
    %c0_17 = arith.constant 0 : index
    %c0_18 = arith.constant 0 : index
    %10 = vector.load %arg3[%c0_15, %c0_16, %c0_17, %c0_18] : memref<2x4x1x4xf32, #tpu.memory_space<vmem>>, vector<1x1x1x4xf32>
    %11 = vector.shape_cast %10 : vector<1x1x1x4xf32> to vector<1x4xf32>
    %c0_19 = arith.constant 0 : index
    %c1_20 = arith.constant 1 : index
    %c0_21 = arith.constant 0 : index
    %c0_22 = arith.constant 0 : index
    %12 = vector.load %arg3[%c0_19, %c1_20, %c0_21, %c0_22] : memref<2x4x1x4xf32, #tpu.memory_space<vmem>>, vector<1x1x1x4xf32>
    %13 = vector.shape_cast %12 : vector<1x1x1x4xf32> to vector<1x4xf32>
    %c0_23 = arith.constant 0 : index
    %c2_24 = arith.constant 2 : index
    %c0_25 = arith.constant 0 : index
    %c0_26 = arith.constant 0 : index
    %14 = vector.load %arg3[%c0_23, %c2_24, %c0_25, %c0_26] : memref<2x4x1x4xf32, #tpu.memory_space<vmem>>, vector<1x1x1x4xf32>
    %15 = vector.shape_cast %14 : vector<1x1x1x4xf32> to vector<1x4xf32>
    %c0_27 = arith.constant 0 : index
    %c3_28 = arith.constant 3 : index
    %c0_29 = arith.constant 0 : index
    %c0_30 = arith.constant 0 : index
    %16 = vector.load %arg3[%c0_27, %c3_28, %c0_29, %c0_30] : memref<2x4x1x4xf32, #tpu.memory_space<vmem>>, vector<1x1x1x4xf32>
    %17 = vector.shape_cast %16 : vector<1x1x1x4xf32> to vector<1x4xf32>
    %cst = arith.constant dense<0.000000e+00> : vector<32x4xf32>
    %18 = tpu.matmul %1, %3, %cst {dimension_numbers = #tpu.dot_dimension_numbers<[1], [0], [0], [1], [0, 0, 1, 1], [], []>} : vector<32x4xbf16>, vector<4x4xbf16>, vector<32x4xf32> -> vector<32x4xf32>
    %19 = vector.broadcast %11 : vector<1x4xf32> to vector<32x4xf32>
    %20 = arith.addf %18, %19 : vector<32x4xf32>
    %21 = arith.truncf %20 : vector<32x4xf32> to vector<32x4xbf16>
    %cst_31 = arith.constant dense<0.000000e+00> : vector<32x4xf32>
    %22 = tpu.matmul %1, %5, %cst_31 {dimension_numbers = #tpu.dot_dimension_numbers<[1], [0], [0], [1], [0, 0, 1, 1], [], []>} : vector<32x4xbf16>, vector<4x4xbf16>, vector<32x4xf32> -> vector<32x4xf32>
    %23 = vector.broadcast %13 : vector<1x4xf32> to vector<32x4xf32>
    %24 = arith.addf %22, %23 : vector<32x4xf32>
    %25 = arith.truncf %24 : vector<32x4xf32> to vector<32x4xbf16>
    %cst_32 = arith.constant dense<0.000000e+00> : vector<32x4xf32>
    %26 = tpu.matmul %1, %7, %cst_32 {dimension_numbers = #tpu.dot_dimension_numbers<[1], [0], [0], [1], [0, 0, 1, 1], [], []>} : vector<32x4xbf16>, vector<4x4xbf16>, vector<32x4xf32> -> vector<32x4xf32>
    %27 = vector.broadcast %15 : vector<1x4xf32> to vector<32x4xf32>
    %28 = arith.addf %26, %27 : vector<32x4xf32>
    %29 = arith.truncf %28 : vector<32x4xf32> to vector<32x4xbf16>
    %30 = vector.shape_cast %21 : vector<32x4xbf16> to vector<2x16x4xbf16>
    %31 = vector.shape_cast %25 : vector<32x4xbf16> to vector<2x16x4xbf16>
    %32 = vector.shape_cast %29 : vector<32x4xbf16> to vector<2x16x4xbf16>
    "tpu.trace_start"() <{level = 10 : i32, message = "bqd,bkd->bqk"}> : () -> ()
    %cst_33 = arith.constant dense<0.000000e+00> : vector<2x16x16xf32>
    %33 = tpu.matmul %30, %31, %cst_33 {dimension_numbers = #tpu.dot_dimension_numbers<[2], [2], [1], [1], [0, 0, 0, 1, 1, 1], [0], [0]>} : vector<2x16x4xbf16>, vector<2x16x4xbf16>, vector<2x16x16xf32> -> vector<2x16x16xf32>
    "tpu.trace_stop"() : () -> ()
    %cst_34 = arith.constant 5.000000e-01 : f32
    %34 = vector.broadcast %cst_34 : f32 to vector<2x16x16xf32>
    %35 = arith.mulf %33, %34 : vector<2x16x16xf32>
    %cst_35 = arith.constant dense<0xFF800000> : vector<2x16xf32>
    %36 = vector.multi_reduction <maximumf>, %35, %cst_35 [2] : vector<2x16x16xf32> to vector<2x16xf32>
    %37 = vector.shape_cast %36 : vector<2x16xf32> to vector<2x16x1xf32>
    %38 = vector.broadcast %37 : vector<2x16x1xf32> to vector<2x16x16xf32>
    %39 = arith.subf %35, %38 : vector<2x16x16xf32>
    %40 = math.exp %39 : vector<2x16x16xf32>
    %cst_36 = arith.constant dense<0.000000e+00> : vector<2x16xf32>
    %41 = vector.multi_reduction <add>, %40, %cst_36 [2] : vector<2x16x16xf32> to vector<2x16xf32>
    %42 = vector.shape_cast %41 : vector<2x16xf32> to vector<2x16x1xf32>
    %43 = tpu.reciprocal %42 {approx = true} : vector<2x16x1xf32> -> vector<2x16x1xf32>
    %44 = vector.broadcast %43 : vector<2x16x1xf32> to vector<2x16x16xf32>
    %45 = arith.mulf %40, %44 : vector<2x16x16xf32>
    %46 = arith.truncf %45 : vector<2x16x16xf32> to vector<2x16x16xbf16>
    "tpu.trace_start"() <{level = 10 : i32, message = "bqk,bkd->bqd"}> : () -> ()
    %cst_37 = arith.constant dense<0.000000e+00> : vector<2x16x4xf32>
    %47 = tpu.matmul %46, %32, %cst_37 {dimension_numbers = #tpu.dot_dimension_numbers<[2], [1], [1], [2], [0, 0, 0, 1, 1, 2], [0], [0]>} : vector<2x16x16xbf16>, vector<2x16x4xbf16>, vector<2x16x4xf32> -> vector<2x16x4xf32>
    "tpu.trace_stop"() : () -> ()
    %48 = vector.shape_cast %47 : vector<2x16x4xf32> to vector<32x4xf32>
    %49 = arith.truncf %48 : vector<32x4xf32> to vector<32x4xbf16>
    %cst_38 = arith.constant dense<0.000000e+00> : vector<32x4xf32>
    %50 = tpu.matmul %49, %9, %cst_38 {dimension_numbers = #tpu.dot_dimension_numbers<[1], [0], [0], [1], [0, 0, 1, 1], [], []>} : vector<32x4xbf16>, vector<4x4xbf16>, vector<32x4xf32> -> vector<32x4xf32>
    %51 = vector.broadcast %17 : vector<1x4xf32> to vector<32x4xf32>
    %52 = arith.addf %50, %51 : vector<32x4xf32>
    %53 = arith.truncf %52 : vector<32x4xf32> to vector<32x4xbf16>
    %c1_39 = arith.constant 1 : index
    %c0_40 = arith.constant 0 : index
    %c0_41 = arith.constant 0 : index
    %c0_42 = arith.constant 0 : index
    %54 = vector.load %arg2[%c1_39, %c0_40, %c0_41, %c0_42] : memref<2x4x4x4xbf16, #tpu.memory_space<vmem>>, vector<1x1x4x4xbf16>
    %55 = vector.shape_cast %54 : vector<1x1x4x4xbf16> to vector<4x4xbf16>
    %c1_43 = arith.constant 1 : index
    %c1_44 = arith.constant 1 : index
    %c0_45 = arith.constant 0 : index
    %c0_46 = arith.constant 0 : index
    %56 = vector.load %arg2[%c1_43, %c1_44, %c0_45, %c0_46] : memref<2x4x4x4xbf16, #tpu.memory_space<vmem>>, vector<1x1x4x4xbf16>
    %57 = vector.shape_cast %56 : vector<1x1x4x4xbf16> to vector<4x4xbf16>
    %c1_47 = arith.constant 1 : index
    %c2_48 = arith.constant 2 : index
    %c0_49 = arith.constant 0 : index
    %c0_50 = arith.constant 0 : index
    %58 = vector.load %arg2[%c1_47, %c2_48, %c0_49, %c0_50] : memref<2x4x4x4xbf16, #tpu.memory_space<vmem>>, vector<1x1x4x4xbf16>
    %59 = vector.shape_cast %58 : vector<1x1x4x4xbf16> to vector<4x4xbf16>
    %c1_51 = arith.constant 1 : index
    %c3_52 = arith.constant 3 : index
    %c0_53 = arith.constant 0 : index
    %c0_54 = arith.constant 0 : index
    %60 = vector.load %arg2[%c1_51, %c3_52, %c0_53, %c0_54] : memref<2x4x4x4xbf16, #tpu.memory_space<vmem>>, vector<1x1x4x4xbf16>
    %61 = vector.shape_cast %60 : vector<1x1x4x4xbf16> to vector<4x4xbf16>
    %c1_55 = arith.constant 1 : index
    %c0_56 = arith.constant 0 : index
    %c0_57 = arith.constant 0 : index
    %c0_58 = arith.constant 0 : index
    %62 = vector.load %arg3[%c1_55, %c0_56, %c0_57, %c0_58] : memref<2x4x1x4xf32, #tpu.memory_space<vmem>>, vector<1x1x1x4xf32>
    %63 = vector.shape_cast %62 : vector<1x1x1x4xf32> to vector<1x4xf32>
    %c1_59 = arith.constant 1 : index
    %c1_60 = arith.constant 1 : index
    %c0_61 = arith.constant 0 : index
    %c0_62 = arith.constant 0 : index
    %64 = vector.load %arg3[%c1_59, %c1_60, %c0_61, %c0_62] : memref<2x4x1x4xf32, #tpu.memory_space<vmem>>, vector<1x1x1x4xf32>
    %65 = vector.shape_cast %64 : vector<1x1x1x4xf32> to vector<1x4xf32>
    %c1_63 = arith.constant 1 : index
    %c2_64 = arith.constant 2 : index
    %c0_65 = arith.constant 0 : index
    %c0_66 = arith.constant 0 : index
    %66 = vector.load %arg3[%c1_63, %c2_64, %c0_65, %c0_66] : memref<2x4x1x4xf32, #tpu.memory_space<vmem>>, vector<1x1x1x4xf32>
    %67 = vector.shape_cast %66 : vector<1x1x1x4xf32> to vector<1x4xf32>
    %c1_67 = arith.constant 1 : index
    %c3_68 = arith.constant 3 : index
    %c0_69 = arith.constant 0 : index
    %c0_70 = arith.constant 0 : index
    %68 = vector.load %arg3[%c1_67, %c3_68, %c0_69, %c0_70] : memref<2x4x1x4xf32, #tpu.memory_space<vmem>>, vector<1x1x1x4xf32>
    %69 = vector.shape_cast %68 : vector<1x1x1x4xf32> to vector<1x4xf32>
    %cst_71 = arith.constant dense<0.000000e+00> : vector<32x4xf32>
    %70 = tpu.matmul %53, %55, %cst_71 {dimension_numbers = #tpu.dot_dimension_numbers<[1], [0], [0], [1], [0, 0, 1, 1], [], []>} : vector<32x4xbf16>, vector<4x4xbf16>, vector<32x4xf32> -> vector<32x4xf32>
    %71 = vector.broadcast %63 : vector<1x4xf32> to vector<32x4xf32>
    %72 = arith.addf %70, %71 : vector<32x4xf32>
    %73 = arith.truncf %72 : vector<32x4xf32> to vector<32x4xbf16>
    %cst_72 = arith.constant dense<0.000000e+00> : vector<32x4xf32>
    %74 = tpu.matmul %53, %57, %cst_72 {dimension_numbers = #tpu.dot_dimension_numbers<[1], [0], [0], [1], [0, 0, 1, 1], [], []>} : vector<32x4xbf16>, vector<4x4xbf16>, vector<32x4xf32> -> vector<32x4xf32>
    %75 = vector.broadcast %65 : vector<1x4xf32> to vector<32x4xf32>
    %76 = arith.addf %74, %75 : vector<32x4xf32>
    %77 = arith.truncf %76 : vector<32x4xf32> to vector<32x4xbf16>
    %cst_73 = arith.constant dense<0.000000e+00> : vector<32x4xf32>
    %78 = tpu.matmul %53, %59, %cst_73 {dimension_numbers = #tpu.dot_dimension_numbers<[1], [0], [0], [1], [0, 0, 1, 1], [], []>} : vector<32x4xbf16>, vector<4x4xbf16>, vector<32x4xf32> -> vector<32x4xf32>
    %79 = vector.broadcast %67 : vector<1x4xf32> to vector<32x4xf32>
    %80 = arith.addf %78, %79 : vector<32x4xf32>
    %81 = arith.truncf %80 : vector<32x4xf32> to vector<32x4xbf16>
    %82 = vector.shape_cast %73 : vector<32x4xbf16> to vector<2x16x4xbf16>
    %83 = vector.shape_cast %77 : vector<32x4xbf16> to vector<2x16x4xbf16>
    %84 = vector.shape_cast %81 : vector<32x4xbf16> to vector<2x16x4xbf16>
    "tpu.trace_start"() <{level = 10 : i32, message = "bqd,bkd->bqk"}> : () -> ()
    %cst_74 = arith.constant dense<0.000000e+00> : vector<2x16x16xf32>
    %85 = tpu.matmul %82, %83, %cst_74 {dimension_numbers = #tpu.dot_dimension_numbers<[2], [2], [1], [1], [0, 0, 0, 1, 1, 1], [0], [0]>} : vector<2x16x4xbf16>, vector<2x16x4xbf16>, vector<2x16x16xf32> -> vector<2x16x16xf32>
    "tpu.trace_stop"() : () -> ()
    %cst_75 = arith.constant 5.000000e-01 : f32
    %86 = vector.broadcast %cst_75 : f32 to vector<2x16x16xf32>
    %87 = arith.mulf %85, %86 : vector<2x16x16xf32>
    %cst_76 = arith.constant dense<0xFF800000> : vector<2x16xf32>
    %88 = vector.multi_reduction <maximumf>, %87, %cst_76 [2] : vector<2x16x16xf32> to vector<2x16xf32>
    %89 = vector.shape_cast %88 : vector<2x16xf32> to vector<2x16x1xf32>
    %90 = vector.broadcast %89 : vector<2x16x1xf32> to vector<2x16x16xf32>
    %91 = arith.subf %87, %90 : vector<2x16x16xf32>
    %92 = math.exp %91 : vector<2x16x16xf32>
    %cst_77 = arith.constant dense<0.000000e+00> : vector<2x16xf32>
    %93 = vector.multi_reduction <add>, %92, %cst_77 [2] : vector<2x16x16xf32> to vector<2x16xf32>
    %94 = vector.shape_cast %93 : vector<2x16xf32> to vector<2x16x1xf32>
    %95 = tpu.reciprocal %94 {approx = true} : vector<2x16x1xf32> -> vector<2x16x1xf32>
    %96 = vector.broadcast %95 : vector<2x16x1xf32> to vector<2x16x16xf32>
    %97 = arith.mulf %92, %96 : vector<2x16x16xf32>
    %98 = arith.truncf %97 : vector<2x16x16xf32> to vector<2x16x16xbf16>
    "tpu.trace_start"() <{level = 10 : i32, message = "bqk,bkd->bqd"}> : () -> ()
    %cst_78 = arith.constant dense<0.000000e+00> : vector<2x16x4xf32>
    %99 = tpu.matmul %98, %84, %cst_78 {dimension_numbers = #tpu.dot_dimension_numbers<[2], [1], [1], [2], [0, 0, 0, 1, 1, 2], [0], [0]>} : vector<2x16x16xbf16>, vector<2x16x4xbf16>, vector<2x16x4xf32> -> vector<2x16x4xf32>
    "tpu.trace_stop"() : () -> ()
    %100 = vector.shape_cast %99 : vector<2x16x4xf32> to vector<32x4xf32>
    %101 = arith.truncf %100 : vector<32x4xf32> to vector<32x4xbf16>
    %cst_79 = arith.constant dense<0.000000e+00> : vector<32x4xf32>
    %102 = tpu.matmul %101, %61, %cst_79 {dimension_numbers = #tpu.dot_dimension_numbers<[1], [0], [0], [1], [0, 0, 1, 1], [], []>} : vector<32x4xbf16>, vector<4x4xbf16>, vector<32x4xf32> -> vector<32x4xf32>
    %103 = vector.broadcast %69 : vector<1x4xf32> to vector<32x4xf32>
    %104 = arith.addf %102, %103 : vector<32x4xf32>
    %105 = arith.truncf %104 : vector<32x4xf32> to vector<32x4xbf16>
    %106 = vector.shape_cast %105 : vector<32x4xbf16> to vector<2x16x4xbf16>
    %107 = arith.extf %106 : vector<2x16x4xbf16> to vector<2x16x4xf32>
    %108 = tpu.transpose %107, [0, 2, 1] : vector<2x16x4xf32> -> vector<2x4x16xf32>
    %109 = vector.shape_cast %108 : vector<2x4x16xf32> to vector<8x16xf32>
    %110 = arith.truncf %109 : vector<8x16xf32> to vector<8x16xbf16>
    %c0_80 = arith.constant 0 : index
    %c0_81 = arith.constant 0 : index
    %111 = vector.load %arg4[%c0_80, %c0_81] : memref<16x24xbf16, #tpu.memory_space<vmem>>, vector<16x24xbf16>
    %cst_82 = arith.constant dense<0.000000e+00> : vector<8x24xf32>
    %112 = tpu.matmul %110, %111, %cst_82 {dimension_numbers = #tpu.dot_dimension_numbers<[1], [0], [0], [1], [0, 0, 1, 1], [], []>} : vector<8x16xbf16>, vector<16x24xbf16>, vector<8x24xf32> -> vector<8x24xf32>
    %c0_83 = arith.constant 0 : index
    %c0_84 = arith.constant 0 : index
    %113 = vector.load %arg5[%c0_83, %c0_84] : memref<1x24xf32, #tpu.memory_space<vmem>>, vector<1x24xf32>
    %114 = vector.broadcast %113 : vector<1x24xf32> to vector<8x24xf32>
    %115 = arith.addf %112, %114 : vector<8x24xf32>
    %c0_85 = arith.constant 0 : index
    %c0_86 = arith.constant 0 : index
    %116 = vector.load %arg6[%c0_85, %c0_86] : memref<8x24xf32, #tpu.memory_space<vmem>>, vector<8x24xf32>
    tpu.vector_store %arg6[%c0_85, %c0_86], %115 {strides = array<i32>} : memref<8x24xf32, #tpu.memory_space<vmem>>, vector<8x24xf32>,
    return
  }
  func.func @transform_0(%arg0: i32) -> (i32, i32, i32) {
    %c0_i32 = arith.constant 0 : i32
    %c0_i32_0 = arith.constant 0 : i32
    %c0_i32_1 = arith.constant 0 : i32
    return %arg0, %c0_i32, %c0_i32_0 : i32, i32, i32
  }
  func.func @transform_1(%arg0: i32) -> (i32, i32, i32, i32) {
    %c0_i32 = arith.constant 0 : i32
    %c0_i32_0 = arith.constant 0 : i32
    %c0_i32_1 = arith.constant 0 : i32
    %c0_i32_2 = arith.constant 0 : i32
    %c0_i32_3 = arith.constant 0 : i32
    return %c0_i32, %c0_i32_0, %c0_i32_1, %c0_i32_2 : i32, i32, i32, i32
  }
  func.func @transform_2(%arg0: i32) -> (i32, i32, i32, i32) {
    %c0_i32 = arith.constant 0 : i32
    %c0_i32_0 = arith.constant 0 : i32
    %c0_i32_1 = arith.constant 0 : i32
    %c0_i32_2 = arith.constant 0 : i32
    %c0_i32_3 = arith.constant 0 : i32
    return %c0_i32, %c0_i32_0, %c0_i32_1, %c0_i32_2 : i32, i32, i32, i32
  }
  func.func @transform_3(%arg0: i32) -> (i32, i32) {
    %c0_i32 = arith.constant 0 : i32
    %c0_i32_0 = arith.constant 0 : i32
    %c0_i32_1 = arith.constant 0 : i32
    return %c0_i32, %c0_i32_0 : i32, i32
  }
  func.func @transform_4(%arg0: i32) -> (i32, i32) {
    %c0_i32 = arith.constant 0 : i32
    %c0_i32_0 = arith.constant 0 : i32
    %c0_i32_1 = arith.constant 0 : i32
    return %c0_i32, %c0_i32_0 : i32, i32
  }
  func.func @transform_5(%arg0: i32) -> (i32, i32) {
    %c0_i32 = arith.constant 0 : i32
    %c0_i32_0 = arith.constant 0 : i32
    return %arg0, %c0_i32 : i32, i32
  }
}

module attributes {stable_mosaic.version = 11 : i64} {
  func.func @_attention_nbeats_kernel(%arg0: i32, %arg1: memref<2x16x4xbf16, #tpu.memory_space<vmem>>, %arg2: memref<2x4x4x4xbf16, #tpu.memory_space<vmem>>, %arg3: memref<2x4x1x4xf32, #tpu.memory_space<vmem>>, %arg4: memref<16x24xbf16, #tpu.memory_space<vmem>>, %arg5: memref<1x24xf32, #tpu.memory_space<vmem>>, %arg6: memref<8x24xf32, #tpu.memory_space<vmem>>) attributes {dimension_semantics = [#tpu.dimension_semantics<parallel>], iteration_bounds = array<i64: 8>, scalar_prefetch = 0 : i64, scratch_operands = 0 : i64, tpu.core_type = #tpu.core_type<tc>, window_params = [{transform_indices = @transform_0, window_bounds = array<i64: 2, 16, 4>}, {pipeline_mode = #tpu.pipeline_mode<synchronous>, transform_indices = @transform_1, window_bounds = array<i64: 2, 4, 4, 4>}, {pipeline_mode = #tpu.pipeline_mode<synchronous>, transform_indices = @transform_2, window_bounds = array<i64: 2, 4, 1, 4>}, {pipeline_mode = #tpu.pipeline_mode<synchronous>, transform_indices = @transform_3, window_bounds = array<i64: 16, 24>}, {pipeline_mode = #tpu.pipeline_mode<synchronous>, transform_indices = @transform_4, window_bounds = array<i64: 1, 24>}, {transform_indices = @transform_5, window_bounds = array<i64: 8, 24>}]} {
    %c0 = arith.constant 0 : index
    %c0_0 = arith.constant 0 : index
    %c0_1 = arith.constant 0 : index
    %0 = vector.load %arg1[%c0, %c0_0, %c0_1] : memref<2x16x4xbf16, #tpu.memory_space<vmem>>, vector<2x16x4xbf16>
    %1 = vector.shape_cast %0 : vector<2x16x4xbf16> to vector<32x4xbf16>
    %c0_2 = arith.constant 0 : index
    %c0_3 = arith.constant 0 : index
    %c0_4 = arith.constant 0 : index
    %c0_5 = arith.constant 0 : index
    %2 = vector.load %arg2[%c0_2, %c0_3, %c0_4, %c0_5] : memref<2x4x4x4xbf16, #tpu.memory_space<vmem>>, vector<1x1x4x4xbf16>
    %3 = vector.shape_cast %2 : vector<1x1x4x4xbf16> to vector<4x4xbf16>
    %c0_6 = arith.constant 0 : index
    %c1 = arith.constant 1 : index
    %c0_7 = arith.constant 0 : index
    %c0_8 = arith.constant 0 : index
    %4 = vector.load %arg2[%c0_6, %c1, %c0_7, %c0_8] : memref<2x4x4x4xbf16, #tpu.memory_space<vmem>>, vector<1x1x4x4xbf16>
    %5 = vector.shape_cast %4 : vector<1x1x4x4xbf16> to vector<4x4xbf16>
    %c0_9 = arith.constant 0 : index
    %c2 = arith.constant 2 : index
    %c0_10 = arith.constant 0 : index
    %c0_11 = arith.constant 0 : index
    %6 = vector.load %arg2[%c0_9, %c2, %c0_10, %c0_11] : memref<2x4x4x4xbf16, #tpu.memory_space<vmem>>, vector<1x1x4x4xbf16>
    %7 = vector.shape_cast %6 : vector<1x1x4x4xbf16> to vector<4x4xbf16>
    %c0_12 = arith.constant 0 : index
    %c3 = arith.constant 3 : index
    %c0_13 = arith.constant 0 : index
    %c0_14 = arith.constant 0 : index
    %8 = vector.load %arg2[%c0_12, %c3, %c0_13, %c0_14] : memref<2x4x4x4xbf16, #tpu.memory_space<vmem>>, vector<1x1x4x4xbf16>
    %9 = vector.shape_cast %8 : vector<1x1x4x4xbf16> to vector<4x4xbf16>
    %c0_15 = arith.constant 0 : index
    %c0_16 = arith.constant 0 : index
    %c0_17 = arith.constant 0 : index
    %c0_18 = arith.constant 0 : index
    %10 = vector.load %arg3[%c0_15, %c0_16, %c0_17, %c0_18] : memref<2x4x1x4xf32, #tpu.memory_space<vmem>>, vector<1x1x1x4xf32>
    %11 = vector.shape_cast %10 : vector<1x1x1x4xf32> to vector<1x4xf32>
    %c0_19 = arith.constant 0 : index
    %c1_20 = arith.constant 1 : index
    %c0_21 = arith.constant 0 : index
    %c0_22 = arith.constant 0 : index
    %12 = vector.load %arg3[%c0_19, %c1_20, %c0_21, %c0_22] : memref<2x4x1x4xf32, #tpu.memory_space<vmem>>, vector<1x1x1x4xf32>
    %13 = vector.shape_cast %12 : vector<1x1x1x4xf32> to vector<1x4xf32>
    %c0_23 = arith.constant 0 : index
    %c2_24 = arith.constant 2 : index
    %c0_25 = arith.constant 0 : index
    %c0_26 = arith.constant 0 : index
    %14 = vector.load %arg3[%c0_23, %c2_24, %c0_25, %c0_26] : memref<2x4x1x4xf32, #tpu.memory_space<vmem>>, vector<1x1x1x4xf32>
    %15 = vector.shape_cast %14 : vector<1x1x1x4xf32> to vector<1x4xf32>
    %c0_27 = arith.constant 0 : index
    %c3_28 = arith.constant 3 : index
    %c0_29 = arith.constant 0 : index
    %c0_30 = arith.constant 0 : index
    %16 = vector.load %arg3[%c0_27, %c3_28, %c0_29, %c0_30] : memref<2x4x1x4xf32, #tpu.memory_space<vmem>>, vector<1x1x1x4xf32>
    %17 = vector.shape_cast %16 : vector<1x1x1x4xf32> to vector<1x4xf32>
    %cst = arith.constant dense<0.000000e+00> : vector<32x4xf32>
    %18 = tpu.matmul %1, %3, %cst {dimension_numbers = #tpu.dot_dimension_numbers<[1], [0], [0], [1], [0, 0, 1, 1], [], []>} : vector<32x4xbf16>, vector<4x4xbf16>, vector<32x4xf32> -> vector<32x4xf32>
    %19 = vector.broadcast %11 : vector<1x4xf32> to vector<32x4xf32>
    %20 = arith.addf %18, %19 : vector<32x4xf32>
    %21 = arith.truncf %20 : vector<32x4xf32> to vector<32x4xbf16>
    %cst_31 = arith.constant dense<0.000000e+00> : vector<32x4xf32>
    %22 = tpu.matmul %1, %5, %cst_31 {dimension_numbers = #tpu.dot_dimension_numbers<[1], [0], [0], [1], [0, 0, 1, 1], [], []>} : vector<32x4xbf16>, vector<4x4xbf16>, vector<32x4xf32> -> vector<32x4xf32>
    %23 = vector.broadcast %13 : vector<1x4xf32> to vector<32x4xf32>
    %24 = arith.addf %22, %23 : vector<32x4xf32>
    %25 = arith.truncf %24 : vector<32x4xf32> to vector<32x4xbf16>
    %cst_32 = arith.constant dense<0.000000e+00> : vector<32x4xf32>
    %26 = tpu.matmul %1, %7, %cst_32 {dimension_numbers = #tpu.dot_dimension_numbers<[1], [0], [0], [1], [0, 0, 1, 1], [], []>} : vector<32x4xbf16>, vector<4x4xbf16>, vector<32x4xf32> -> vector<32x4xf32>
    %27 = vector.broadcast %15 : vector<1x4xf32> to vector<32x4xf32>
    %28 = arith.addf %26, %27 : vector<32x4xf32>
    %29 = arith.truncf %28 : vector<32x4xf32> to vector<32x4xbf16>
    %30 = vector.shape_cast %21 : vector<32x4xbf16> to vector<2x16x4xbf16>
    %31 = vector.shape_cast %25 : vector<32x4xbf16> to vector<2x16x4xbf16>
    %32 = vector.shape_cast %29 : vector<32x4xbf16> to vector<2x16x4xbf16>
    "tpu.trace_start"() <{level = 10 : i32, message = "bqd,bkd->bqk"}> : () -> ()
    %cst_33 = arith.constant dense<0.000000e+00> : vector<2x16x16xf32>
    %33 = tpu.matmul %30, %31, %cst_33 {dimension_numbers = #tpu.dot_dimension_numbers<[2], [2], [1], [1], [0, 0, 0, 1, 1, 1], [0], [0]>} : vector<2x16x4xbf16>, vector<2x16x4xbf16>, vector<2x16x16xf32> -> vector<2x16x16xf32>
    "tpu.trace_stop"() : () -> ()
    %cst_34 = arith.constant 5.000000e-01 : f32
    %34 = vector.broadcast %cst_34 : f32 to vector<2x16x16xf32>
    %35 = arith.mulf %33, %34 : vector<2x16x16xf32>
    %cst_35 = arith.constant dense<0xFF800000> : vector<2x16xf32>
    %36 = vector.multi_reduction <maximumf>, %35, %cst_35 [2] : vector<2x16x16xf32> to vector<2x16xf32>
    %37 = vector.shape_cast %36 : vector<2x16xf32> to vector<2x16x1xf32>
    %38 = vector.broadcast %37 : vector<2x16x1xf32> to vector<2x16x16xf32>
    %39 = arith.subf %35, %38 : vector<2x16x16xf32>
    %40 = math.exp %39 : vector<2x16x16xf32>
    %cst_36 = arith.constant dense<0.000000e+00> : vector<2x16xf32>
    %41 = vector.multi_reduction <add>, %40, %cst_36 [2] : vector<2x16x16xf32> to vector<2x16xf32>
    %42 = vector.shape_cast %41 : vector<2x16xf32> to vector<2x16x1xf32>
    %43 = tpu.reciprocal %42 {approx = true} : vector<2x16x1xf32> -> vector<2x16x1xf32>
    %44 = vector.broadcast %43 : vector<2x16x1xf32> to vector<2x16x16xf32>
    %45 = arith.mulf %40, %44 : vector<2x16x16xf32>
    %46 = arith.truncf %45 : vector<2x16x16xf32> to vector<2x16x16xbf16>
    "tpu.trace_start"() <{level = 10 : i32, message = "bqk,bkd->bqd"}> : () -> ()
    %cst_37 = arith.constant dense<0.000000e+00> : vector<2x16x4xf32>
    %47 = tpu.matmul %46, %32, %cst_37 {dimension_numbers = #tpu.dot_dimension_numbers<[2], [1], [1], [2], [0, 0, 0, 1, 1, 2], [0], [0]>} : vector<2x16x16xbf16>, vector<2x16x4xbf16>, vector<2x16x4xf32> -> vector<2x16x4xf32>
    "tpu.trace_stop"() : () -> ()
    %48 = vector.shape_cast %47 : vector<2x16x4xf32> to vector<32x4xf32>
    %49 = arith.truncf %48 : vector<32x4xf32> to vector<32x4xbf16>
    %cst_38 = arith.constant dense<0.000000e+00> : vector<32x4xf32>
    %50 = tpu.matmul %49, %9, %cst_38 {dimension_numbers = #tpu.dot_dimension_numbers<[1], [0], [0], [1], [0, 0, 1, 1], [], []>} : vector<32x4xbf16>, vector<4x4xbf16>, vector<32x4xf32> -> vector<32x4xf32>
    %51 = vector.broadcast %17 : vector<1x4xf32> to vector<32x4xf32>
    %52 = arith.addf %50, %51 : vector<32x4xf32>
    %53 = arith.truncf %52 : vector<32x4xf32> to vector<32x4xbf16>
    %c1_39 = arith.constant 1 : index
    %c0_40 = arith.constant 0 : index
    %c0_41 = arith.constant 0 : index
    %c0_42 = arith.constant 0 : index
    %54 = vector.load %arg2[%c1_39, %c0_40, %c0_41, %c0_42] : memref<2x4x4x4xbf16, #tpu.memory_space<vmem>>, vector<1x1x4x4xbf16>
    %55 = vector.shape_cast %54 : vector<1x1x4x4xbf16> to vector<4x4xbf16>
    %c1_43 = arith.constant 1 : index
    %c1_44 = arith.constant 1 : index
    %c0_45 = arith.constant 0 : index
    %c0_46 = arith.constant 0 : index
    %56 = vector.load %arg2[%c1_43, %c1_44, %c0_45, %c0_46] : memref<2x4x4x4xbf16, #tpu.memory_space<vmem>>, vector<1x1x4x4xbf16>
    %57 = vector.shape_cast %56 : vector<1x1x4x4xbf16> to vector<4x4xbf16>
    %c1_47 = arith.constant 1 : index
    %c2_48 = arith.constant 2 : index
    %c0_49 = arith.constant 0 : index
    %c0_50 = arith.constant 0 : index
    %58 = vector.load %arg2[%c1_47, %c2_48, %c0_49, %c0_50] : memref<2x4x4x4xbf16, #tpu.memory_space<vmem>>, vector<1x1x4x4xbf16>
    %59 = vector.shape_cast %58 : vector<1x1x4x4xbf16> to vector<4x4xbf16>
    %c1_51 = arith.constant 1 : index
    %c3_52 = arith.constant 3 : index
    %c0_53 = arith.constant 0 : index
    %c0_54 = arith.constant 0 : index
    %60 = vector.load %arg2[%c1_51, %c3_52, %c0_53, %c0_54] : memref<2x4x4x4xbf16, #tpu.memory_space<vmem>>, vector<1x1x4x4xbf16>
    %61 = vector.shape_cast %60 : vector<1x1x4x4xbf16> to vector<4x4xbf16>
    %c1_55 = arith.constant 1 : index
    %c0_56 = arith.constant 0 : index
    %c0_57 = arith.constant 0 : index
    %c0_58 = arith.constant 0 : index
    %62 = vector.load %arg3[%c1_55, %c0_56, %c0_57, %c0_58] : memref<2x4x1x4xf32, #tpu.memory_space<vmem>>, vector<1x1x1x4xf32>
    %63 = vector.shape_cast %62 : vector<1x1x1x4xf32> to vector<1x4xf32>
    %c1_59 = arith.constant 1 : index
    %c1_60 = arith.constant 1 : index
    %c0_61 = arith.constant 0 : index
    %c0_62 = arith.constant 0 : index
    %64 = vector.load %arg3[%c1_59, %c1_60, %c0_61, %c0_62] : memref<2x4x1x4xf32, #tpu.memory_space<vmem>>, vector<1x1x1x4xf32>
    %65 = vector.shape_cast %64 : vector<1x1x1x4xf32> to vector<1x4xf32>
    %c1_63 = arith.constant 1 : index
    %c2_64 = arith.constant 2 : index
    %c0_65 = arith.constant 0 : index
    %c0_66 = arith.constant 0 : index
    %66 = vector.load %arg3[%c1_63, %c2_64, %c0_65, %c0_66] : memref<2x4x1x4xf32, #tpu.memory_space<vmem>>, vector<1x1x1x4xf32>
    %67 = vector.shape_cast %66 : vector<1x1x1x4xf32> to vector<1x4xf32>
    %c1_67 = arith.constant 1 : index
    %c3_68 = arith.constant 3 : index
    %c0_69 = arith.constant 0 : index
    %c0_70 = arith.constant 0 : index
    %68 = vector.load %arg3[%c1_67, %c3_68, %c0_69, %c0_70] : memref<2x4x1x4xf32, #tpu.memory_space<vmem>>, vector<1x1x1x4xf32>
    %69 = vector.shape_cast %68 : vector<1x1x1x4xf32> to vector<1x4xf32>
    %cst_71 = arith.constant dense<0.000000e+00> : vector<32x4xf32>
    %70 = tpu.matmul %53, %55, %cst_71 {dimension_numbers = #tpu.dot_dimension_numbers<[1], [0], [0], [1], [0, 0, 1, 1], [], []>} : vector<32x4xbf16>, vector<4x4xbf16>, vector<32x4xf32> -> vector<32x4xf32>
    %71 = vector.broadcast %63 : vector<1x4xf32> to vector<32x4xf32>
    %72 = arith.addf %70, %71 : vector<32x4xf32>
    %73 = arith.truncf %72 : vector<32x4xf32> to vector<32x4xbf16>
    %cst_72 = arith.constant dense<0.000000e+00> : vector<32x4xf32>
    %74 = tpu.matmul %53, %57, %cst_72 {dimension_numbers = #tpu.dot_dimension_numbers<[1], [0], [0], [1], [0, 0, 1, 1], [], []>} : vector<32x4xbf16>, vector<4x4xbf16>, vector<32x4xf32> -> vector<32x4xf32>
    %75 = vector.broadcast %65 : vector<1x4xf32> to vector<32x4xf32>
    %76 = arith.addf %74, %75 : vector<32x4xf32>
    %77 = arith.truncf %76 : vector<32x4xf32> to vector<32x4xbf16>
    %cst_73 = arith.constant dense<0.000000e+00> : vector<32x4xf32>
    %78 = tpu.matmul %53, %59, %cst_73 {dimension_numbers = #tpu.dot_dimension_numbers<[1], [0], [0], [1], [0, 0, 1, 1], [], []>} : vector<32x4xbf16>, vector<4x4xbf16>, vector<32x4xf32> -> vector<32x4xf32>
    %79 = vector.broadcast %67 : vector<1x4xf32> to vector<32x4xf32>
    %80 = arith.addf %78, %79 : vector<32x4xf32>
    %81 = arith.truncf %80 : vector<32x4xf32> to vector<32x4xbf16>
    %82 = vector.shape_cast %73 : vector<32x4xbf16> to vector<2x16x4xbf16>
    %83 = vector.shape_cast %77 : vector<32x4xbf16> to vector<2x16x4xbf16>
    %84 = vector.shape_cast %81 : vector<32x4xbf16> to vector<2x16x4xbf16>
    "tpu.trace_start"() <{level = 10 : i32, message = "bqd,bkd->bqk"}> : () -> ()
    %cst_74 = arith.constant dense<0.000000e+00> : vector<2x16x16xf32>
    %85 = tpu.matmul %82, %83, %cst_74 {dimension_numbers = #tpu.dot_dimension_numbers<[2], [2], [1], [1], [0, 0, 0, 1, 1, 1], [0], [0]>} : vector<2x16x4xbf16>, vector<2x16x4xbf16>, vector<2x16x16xf32> -> vector<2x16x16xf32>
    "tpu.trace_stop"() : () -> ()
    %cst_75 = arith.constant 5.000000e-01 : f32
    %86 = vector.broadcast %cst_75 : f32 to vector<2x16x16xf32>
    %87 = arith.mulf %85, %86 : vector<2x16x16xf32>
    %cst_76 = arith.constant dense<0xFF800000> : vector<2x16xf32>
    %88 = vector.multi_reduction <maximumf>, %87, %cst_76 [2] : vector<2x16x16xf32> to vector<2x16xf32>
    %89 = vector.shape_cast %88 : vector<2x16xf32> to vector<2x16x1xf32>
    %90 = vector.broadcast %89 : vector<2x16x1xf32> to vector<2x16x16xf32>
    %91 = arith.subf %87, %90 : vector<2x16x16xf32>
    %92 = math.exp %91 : vector<2x16x16xf32>
    %cst_77 = arith.constant dense<0.000000e+00> : vector<2x16xf32>
    %93 = vector.multi_reduction <add>, %92, %cst_77 [2] : vector<2x16x16xf32> to vector<2x16xf32>
    %94 = vector.shape_cast %93 : vector<2x16xf32> to vector<2x16x1xf32>
    %95 = tpu.reciprocal %94 {approx = true} : vector<2x16x1xf32> -> vector<2x16x1xf32>
    %96 = vector.broadcast %95 : vector<2x16x1xf32> to vector<2x16x16xf32>
    %97 = arith.mulf %92, %96 : vector<2x16x16xf32>
    %98 = arith.truncf %97 : vector<2x16x16xf32> to vector<2x16x16xbf16>
    "tpu.trace_start"() <{level = 10 : i32, message = "bqk,bkd->bqd"}> : () -> ()
    %cst_78 = arith.constant dense<0.000000e+00> : vector<2x16x4xf32>
    %99 = tpu.matmul %98, %84, %cst_78 {dimension_numbers = #tpu.dot_dimension_numbers<[2], [1], [1], [2], [0, 0, 0, 1, 1, 2], [0], [0]>} : vector<2x16x16xbf16>, vector<2x16x4xbf16>, vector<2x16x4xf32> -> vector<2x16x4xf32>
    "tpu.trace_stop"() : () -> ()
    %100 = vector.shape_cast %99 : vector<2x16x4xf32> to vector<32x4xf32>
    %101 = arith.truncf %100 : vector<32x4xf32> to vector<32x4xbf16>
    %cst_79 = arith.constant dense<0.000000e+00> : vector<32x4xf32>
    %102 = tpu.matmul %101, %61, %cst_79 {dimension_numbers = #tpu.dot_dimension_numbers<[1], [0], [0], [1], [0, 0, 1, 1], [], []>} : vector<32x4xbf16>, vector<4x4xbf16>, vector<32x4xf32> -> vector<32x4xf32>
    %103 = vector.broadcast %69 : vector<1x4xf32> to vector<32x4xf32>
    %104 = arith.addf %102, %103 : vector<32x4xf32>
    %105 = arith.truncf %104 : vector<32x4xf32> to vector<32x4xbf16>
    %106 = vector.shape_cast %105 : vector<32x4xbf16> to vector<2x16x4xbf16>
    %107 = arith.extf %106 : vector<2x16x4xbf16> to vector<2x16x4xf32>
    %108 = tpu.transpose %107, [0, 2, 1] : vector<2x16x4xf32> -> vector<2x4x16xf32>
    %109 = vector.shape_cast %108 : vector<2x4x16xf32> to vector<8x16xf32>
    %110 = arith.truncf %109 : vector<8x16xf32> to vector<8x16xbf16>
    %c0_80 = arith.constant 0 : index
    %c0_81 = arith.constant 0 : index
    %111 = vector.load %arg4[%c0_80, %c0_81] : memref<16x24xbf16, #tpu.memory_space<vmem>>, vector<16x24xbf16>
    %cst_82 = arith.constant dense<0.000000e+00> : vector<8x24xf32>
    %112 = tpu.matmul %110, %111, %cst_82 {dimension_numbers = #tpu.dot_dimension_numbers<[1], [0], [0], [1], [0, 0, 1, 1], [], []>} : vector<8x16xbf16>, vector<16x24xbf16>, vector<8x24xf32> -> vector<8x24xf32>
    %c0_83 = arith.constant 0 : index
    %c0_84 = arith.constant 0 : index
    %113 = vector.load %arg5[%c0_83, %c0_84] : memref<1x24xf32, #tpu.memory_space<vmem>>, vector<1x24xf32>
    %114 = vector.broadcast %113 : vector<1x24xf32> to vector<8x24xf32>
    %115 = arith.addf %112, %114 : vector<8x24xf32>
    %c0_85 = arith.constant 0 : index
    %c0_86 = arith.constant 0 : index
    %116 = vector.load %arg6[%c0_85, %c0_86] : memref<8x24xf32, #tpu.memory_space<vmem>>, vector<8x24xf32>
    tpu.vector_store %arg6[%c0_85, %c0_86], %115 {strides = array<i32>} : memref<8x24xf32, #tpu.memory_space<vmem>>, vector<8x24xf32>,
    return
  }
  func.func @transform_0(%arg0: i32) -> (i32, i32, i32) {
    %c0_i32 = arith.constant 0 : i32
    %c0_i32_0 = arith.constant 0 : i32
    %c0_i32_1 = arith.constant 0 : i32
    return %arg0, %c0_i32, %c0_i32_0 : i32, i32, i32
  }
  func.func @transform_1(%arg0: i32) -> (i32, i32, i32, i32) {
    %c0_i32 = arith.constant 0 : i32
    %c0_i32_0 = arith.constant 0 : i32
    %c0_i32_1 = arith.constant 0 : i32
    %c0_i32_2 = arith.constant 0 : i32
    %c0_i32_3 = arith.constant 0 : i32
    return %c0_i32, %c0_i32_0, %c0_i32_1, %c0_i32_2 : i32, i32, i32, i32
  }
  func.func @transform_2(%arg0: i32) -> (i32, i32, i32, i32) {
    %c0_i32 = arith.constant 0 : i32
    %c0_i32_0 = arith.constant 0 : i32
    %c0_i32_1 = arith.constant 0 : i32
    %c0_i32_2 = arith.constant 0 : i32
    %c0_i32_3 = arith.constant 0 : i32
    return %c0_i32, %c0_i32_0, %c0_i32_1, %c0_i32_2 : i32, i32, i32, i32
  }
  func.func @transform_3(%arg0: i32) -> (i32, i32) {
    %c0_i32 = arith.constant 0 : i32
    %c0_i32_0 = arith.constant 0 : i32
    %c0_i32_1 = arith.constant 0 : i32
    return %c0_i32, %c0_i32_0 : i32, i32
  }
  func.func @transform_4(%arg0: i32) -> (i32, i32) {
    %c0_i32 = arith.constant 0 : i32
    %c0_i32_0 = arith.constant 0 : i32
    %c0_i32_1 = arith.constant 0 : i32
    return %c0_i32, %c0_i32_0 : i32, i32
  }
  func.func @transform_5(%arg0: i32) -> (i32, i32) {
    %c0_i32 = arith.constant 0 : i32
    %c0_i32_0 = arith.constant 0 : i32
    return %arg0, %c0_i32 : i32, i32
  }
}

</mosaic_0001>

<bundles_post_ra>
// kernel: tpu_custom_call.1
= control target key start
LH: loop header
LB: loop body
LE: loop exit
PB: predicated region body
PF: predicated region fallthrough
CT: control target
= control target key end

     0   :  { %s1743_s18 = smov 0   ;;  %s1907_s0 = inlined_call_operand.vmem [shape: bf16[16,16,4], index: 0, kind: input, shape index: {}]   ;;  %s1908_s1 = inlined_call_operand.vmem [shape: bf16[2,4,4,4], index: 1, kind: input, shape index: {}]   ;;  %s1909_s2 = inlined_call_operand.vmem [shape: f32[2,4,1,4], index: 2, kind: input, shape index: {}]   ;;  %s1910_s3 = inlined_call_operand.vmem [shape: bf16[16,24], index: 3, kind: input, shape index: {}]   ;;  %s1911_s4 = inlined_call_operand.vmem [shape: f32[1,24], index: 4, kind: input, shape index: {}]   ;;  %s1912_s5 = inlined_call_operand.vmem [shape: f32[64,24], index: 5, kind: output, shape index: {}]  }
   0x1 LB: > { %s1749_s19 = sadd.s32 4294967295, %s1709_s18   ;;  %p1438_p0 = scmp.ge.s32.totalorder %s1709_s18, 1  ;;  %s1709_s18 = sphi %s1743_s18, %s15_s18  }
   0x2   : > { %p189_p1 = scmp.lt.s32.totalorder %s1709_s18, 9 }
   0x4   : > { %p190_p2 = pnand %p1438_p0, %p189_p1 }
   0x5   : > { %v1443_v0 = vld [vmem:[%s1908_s1 + $0x2] sm:$0x3] (!%p190_p2)  ;;  %vm270_vm0 = vcmask (!%p190_p2), 1041408   ;;  %s1439_s22 = sshll.u32 (!%p190_p2), %s1749_s19, 1  ;;  %v233_v2 = vld [vmem:[%s1908_s1] sm:$0x3] (!%p190_p2) }
   0x6   : > { %193 = sbr.rel (%p190_p2) target bundleno = 2765 (0xacd), region = 40  ;;  %1642 = vmatprep.subr.msk.bf16.mxu1 (!%p190_p2), %vm270_vm0, %v1443_v0  ;;  %v332_v1 = vsel (!%p190_p2), %vm270_vm0, %v1443_v0, 0  ;;  %p218_p3 = scmp.lt.s32.totalorder (!%p190_p2), %s1439_s22, 15  ;;  %v1444_v3 = vld [vmem:[%s1908_s1 + $0x4] sm:$0x3] (!%p190_p2)  ;;  %1641 = vmatprep.subr.msk.bf16.mxu0 (!%p190_p2), %vm270_vm0, %v233_v2  ;;  %v272_v4 = vsel (!%p190_p2), %vm270_vm0, %v233_v2, 0 }
   0x7   : > { %1546 = vmatpush3.bf16.msra.mxu1 (!%p190_p2), %v332_v1  ;;  %1540 = vmatpush3.bf16.msra.mxu0 (!%p190_p2), %v272_v4  ;;  %vm263_vm1 = vcmask (!%p190_p2), 31744   ;;  %v392_v7 = vsel (!%p190_p2), %vm270_vm0, %v1444_v3, 0  ;;  %v1711_v8 = vmov (!%p190_p2), 0.0   ;;  %vm1712_vm2 = vmmov (!%p190_p2), 0   ;;  %v1449_v9 = vld [vmem:[%s1909_s2] ss:$0 sm:$0xff] (!%p190_p2) }
   0x8   : > { %1643 = vmatprep.subr.msk.bf16.mxu0 (!%p190_p2), %vm270_vm0, %v1444_v3  ;;  %1557 = vmatprep.subr.bf16.mxu1 (!%p190_p2), %v1711_v8  ;;  %v1454_v11 = vld [vmem:[%s1909_s2 + $0x1] ss:$0 sm:$0xff] (!%p190_p2)  ;;  %v1457_v31 = vld [vmem:[%s1909_s2 + $0x2] ss:$0 sm:$0xff] (!%p190_p2)  ;;  %vm543_vm3 = vcmask (!%p190_p2), 130048   ;;  %p224_p4 = scmp.lt.s32.totalorder (!%p190_p2), %s1749_s19, 7 }
   0x9   : > { %vm1379_vm4 = vcmask (!%p190_p2), 195584  }
   0xd   : > { %s1914_s22 = smov (!%p218_p3, %s1439_s22), 15  ;;  %s1916_s19 = smov (!%p224_p4, %s1749_s19), 7 }
   0xe   : > { %s1496_s27 = sshll.u32 %s1914_s22, 3  ;;  %s1442_s11 = sshll.u32 %s1916_s19, 3 }
   0xf   : > { %s222_s30 = scalar_lea.vmem %s1907_s0, %s1496_s27  ;;  %s227_s16 = scalar_lea.vmem %s1912_s5, %s1442_s11 }
  0x10   : > { %v1668_v5 = vld [vmem:[%s222_s30] sm:$0xff]   ;;  %v1669_v6 = vld [vmem:[%s222_s30 + $0x8] sm:$0xff]  }
  0x11   : > { %1547 = vmatprep.mubr.msk.bf16.mxu1 %vm263_vm1, %v1668_v5  ;;  %1541 = vmatprep.mubr.msk.bf16.mxu0 %vm263_vm1, %v1668_v5 }
  0x12   : > { %1548 = vmatmul.mubr.msk.bf16.vlgmr.msra.gmra.mrb[0].mxu1 %vm263_vm1, %v1669_v6  ;;  %1542 = vmatmul.mubr.msk.bf16.vlgmr.msra.gmra.mrb[0].mxu0 %vm263_vm1, %v1669_v6 }
  0x13   : > { %1552 = vmatpush3.bf16.msra.mxu0 %v392_v7  ;;  %1553 = vmatprep.mubr.msk.bf16.mxu0 %vm263_vm1, %v1668_v5 }
  0x14   : > { %1563 = vmatprep.subr.bf16.mxu0 %v1711_v8  ;;  %1559 = vmatprep.mubr.msk.bf16.mxu1 %vm1712_vm2, %v1711_v8 }
  0x1a   : > { %1554 = vmatmul.mubr.msk.bf16.vlgmr.msra.gmra.mrb[4].mxu0 %vm263_vm1, %v1669_v6 }
  0x1b   : > { %1565 = vmatprep.mubr.msk.bf16.mxu0 %vm1712_vm2, %v1711_v8 }
  0xe5   : > { %v1549_v10 = vpop.f32.mrb[0].mxu1  ;;  %v1543_v12 = vpop.f32.mrb[0].mxu0 }
  0xe6   : > { %v368_v13 = vpop.f32.mrb[1].mxu1  ;;  %v317_v14 = vadd.f32 %v1543_v12, %v1449_v9  ;;  %v308_v15 = vpop.f32.mrb[1].mxu0  ;;  %v377_v19 = vadd.f32 %v1549_v10, %v1454_v11 }
  0xe7   : > { %v1550_v16 = vpop.f32.mrb[2].mxu1  ;;  %v309_v17 = vadd.f32 %v1449_v9, %v308_v15  ;;  %v1544_v18 = vpop.f32.mrb[2].mxu0  ;;  %v369_v24 = vadd.f32 %v1454_v11, %v368_v13 }
  0xe8   : > { %v380_v20 = vadd.f32 %v1550_v16, %v1454_v11  ;;  %v371_v21 = vpop.f32.mrb[3].mxu1  ;;  %v320_v22 = vadd.f32 %v1544_v18, %v1449_v9  ;;  %v311_v23 = vpop.f32.mrb[3].mxu0 }
  0xe9   : > { %v372_v25 = vadd.f32 %v1454_v11, %v371_v21  ;;  %v312_v26 = vadd.f32 %v1449_v9, %v311_v23 }
  0xea   : > { %v384_v27 = vpack.c.bf16 %v380_v20, %v377_v19  ;;  %v324_v28 = vpack.c.bf16 %v320_v22, %v317_v14 }
  0xeb   : > { %v383_v29 = vpack.c.bf16 %v372_v25, %v369_v24  ;;  %v323_v30 = vpack.c.bf16 %v312_v26, %v309_v17 }
  0xec   : > { %v496_v32 = vsel %vm263_vm1, %v384_v27, 0 }
  0xed   : > { %1564 = vmatpush3.bf16.xpose.msra.mxu0 %v496_v32  ;;  %v449_v33 = vsel %vm263_vm1, %v383_v29, 0  ;;  %v1555_v34 = vpop.f32.mrb[4].mxu0 }
  0xee   : > { %1558 = vmatpush3.bf16.xpose.msra.mxu1 %v449_v33  ;;  %v437_v35 = vadd.f32 %v1555_v34, %v1457_v31  ;;  %v428_v36 = vpop.f32.mrb[5].mxu0  ;;  %1575 = vmatprep.subr.bf16.mxu0 %v1711_v8 }
  0xef   : > { %v429_v37 = vadd.f32 %v1457_v31, %v428_v36  ;;  %v1556_v38 = vpop.f32.mrb[6].mxu0  ;;  %1569 = vmatprep.subr.bf16.mxu1 %v1711_v8 }
  0xf0   : > { %v440_v39 = vadd.f32 %v1556_v38, %v1457_v31  ;;  %v431_v40 = vpop.f32.mrb[7].mxu0 }
  0xf1   : > { %v432_v41 = vadd.f32 %v1457_v31, %v431_v40  ;;  %v1445_v31 = vld [vmem:[%s1908_s1 + $0x6] sm:$0x3] }
  0xf2   : > { %v444_v42 = vpack.c.bf16 %v440_v39, %v437_v35  ;;  %v693_v32 = vsel %vm270_vm0, %v1445_v31, 0 }
  0xf3   : > { %v443_v43 = vpack.c.bf16 %v432_v41, %v429_v37 }
  0xf4   : > { %1566 = vmatmul.mubr.msk.bf16.vlgmr.msra.gmra.mrb[8].mxu0 %vm263_vm1, %v324_v28 }
  0xf5   : > { %1560 = vmatmul.mubr.msk.bf16.vlgmr.msra.gmra.mrb[4].mxu1 %vm263_vm1, %v323_v30  ;;  %1576 = vmatpush3.bf16.msra.mxu0 %v444_v42 }
  0xf6   : > { %1570 = vmatpush3.bf16.msra.mxu1 %v443_v43  ;;  %1571 = vmatprep.mubr.msk.bf16.mxu1 %vm1712_vm2, %v1711_v8  ;;  %v1468_v43 = vld [vmem:[%s1908_s1 + $0xa] sm:$0x3] }
  0xf7   : > { %1577 = vmatprep.mubr.msk.bf16.mxu0 %vm1712_vm2, %v1711_v8  ;;  %1644 = vmatprep.subr.msk.bf16.mxu1 %vm270_vm0, %v1445_v31 }
 0x1c7   : > { %v532_v44 = vpop.f32.mrb[8].mxu0 }
 0x1c8   : > { %v541_v45 = vmul.f32 0.5, %v532_v44  ;;  %v485_v46 = vpop.f32.mrb[4].mxu1  ;;  %v1567_v47 = vpop.f32.mrb[9].mxu0  ;;  %v835_v44 = vsel %vm270_vm0, %v1468_v43, 0 }
 0x1c9   : > { %v539_v48 = vmul.f32 0.5, %v485_v46  ;;  %v1561_v49 = vpop.f32.mrb[5].mxu1  ;;  %v535_v50 = vpop.f32.mrb[10].mxu0  ;;  %v1469_v47 = vld [vmem:[%s1908_s1 + $0xc] sm:$0x3] }
 0x1ca   : > { %v542_v51 = vmul.f32 0.5, %v535_v50  ;;  %v488_v52 = vpop.f32.mrb[6].mxu1  ;;  %v1568_v53 = vpop.f32.mrb[11].mxu0  ;;  %v550_v54 = vsel %vm543_vm3, %v541_v45, -inf  ;;  %v1464_v49 = vld [vmem:[%s1909_s2 + $0x3] ss:$0 sm:$0xff] }
 0x1cb   : > { %v540_v55 = vmul.f32 0.5, %v488_v52  ;;  %551 = vmax.xlane.f32.xlu1 %v550_v54  ;;  %v1562_v56 = vpop.f32.mrb[7].mxu1  ;;  %v544_v57 = vsel %vm543_vm3, %v539_v48, -inf }
 0x1cc   : > { %545 = vmax.xlane.f32.xlu0 %v544_v57  ;;  %v553_v58 = vsel %vm543_vm3, %v542_v51, -inf }
 0x1cd   : > { %v547_v59 = vsel %vm543_vm3, %v540_v55, -inf }
 0x1cf   : > { %554 = vmax.xlane.f32.xlu1 %v553_v58 }
 0x1d0   : > { %548 = vmax.xlane.f32.xlu0 %v547_v59  ;;  %v895_v59 = vsel %vm270_vm0, %v1469_v47, 0 }
 0x258   : > { %v552_v60 = vpop.xlane.xlu1 %551 }
 0x259   : > { %v558_v61 = vsub.f32 %v541_v45, %v552_v60  ;;  %v546_v62 = vpop.xlane.xlu0 %545  ;;  %v1467_v45 = vld [vmem:[%s1908_s1 + $0x8] sm:$0x3] }
 0x25a   : > { %v556_v63 = vsub.f32 %v539_v48, %v546_v62  ;;  %1645 = vmatprep.subr.msk.bf16.mxu0 %vm270_vm0, %v1467_v45  ;;  %v775_v46 = vsel %vm270_vm0, %v1467_v45, 0 }
 0x25b   : > { %v564_v0 = vmul.f32 1.442695, %v558_v61  ;;  %v1475_v61 = vld [vmem:[%s1909_s2 + $0x4] ss:$0 sm:$0xff] }
 0x25c   : > { %v560_v1 = vmul.f32 1.442695, %v556_v63  ;;  %v555_v2 = vpop.xlane.xlu1 %554  ;;  %v1478_v63 = vld [vmem:[%s1909_s2 + $0x5] ss:$0 sm:$0xff] }
 0x25d   : > { %v559_v3 = vsub.f32 %v542_v51, %v555_v2  ;;  %v549_v4 = vpop.xlane.xlu0 %548 }
 0x25e   : > { %1671 = vpow2.f32 %v560_v1  ;;  %v557_v5 = vsub.f32 %v540_v55, %v549_v4 }
 0x25f   : > { %1673 = vpow2.f32 %v564_v0  ;;  %v566_v6 = vmul.f32 1.442695, %v559_v3 }
 0x260   : > { %v562_v7 = vmul.f32 1.442695, %v557_v5 }
 0x262   : > { %1675 = vpow2.f32 %v562_v7 }
 0x263   : > { %1677 = vpow2.f32 %v566_v6 }
 0x268   : > { %v1672_v9 = vpop.eup %1671 }
 0x269   : > { %v568_v10 = vsel %vm543_vm3, %v1672_v9, 0.0  ;;  %v1674_v11 = vpop.eup %1673 }
 0x26a   : > { %569 = vadd.xlane.f32.xlu0 %v568_v10  ;;  %v574_v13 = vsel %vm543_vm3, %v1674_v11, 0.0 }
 0x26c   : > { %v1676_v12 = vpop.eup %1675 }
 0x26d   : > { %v571_v14 = vsel %vm543_vm3, %v1676_v12, 0.0  ;;  %v1678_v15 = vpop.eup %1677 }
 0x26e   : > { %575 = vadd.xlane.f32.xlu0 %v574_v13  ;;  %572 = vadd.xlane.f32.xlu1 %v571_v14  ;;  %v577_v16 = vsel %vm543_vm3, %v1678_v15, 0.0 }
 0x272   : > { %578 = vadd.xlane.f32.xlu1 %v577_v16 }
 0x2f7   : > { %v570_v17 = vpop.xlane.xlu0 %569 }
 0x2f8   : > { %1679 = vrcp.f32 %v570_v17 }
 0x2fb   : > { %v573_v18 = vpop.xlane.xlu1 %572  ;;  %v576_v19 = vpop.xlane.xlu0 %575 }
 0x2fc   : > { %1681 = vrcp.f32 %v573_v18 }
 0x2fd   : > { %1683 = vrcp.f32 %v576_v19 }
 0x2ff   : > { %v579_v20 = vpop.xlane.xlu1 %578 }
 0x300   : > { %1685 = vrcp.f32 %v579_v20 }
 0x302   : > { %v1680_v21 = vpop.eup %1679 }
 0x303   : > { %v584_v23 = vmul.f32 %v1680_v21, %v1672_v9  ;;  %v1481_v21 = vld [vmem:[%s1909_s2 + $0x6] ss:$0 sm:$0xff] }
 0x306   : > { %v1682_v22 = vpop.eup %1681 }
 0x307   : > { %v585_v24 = vmul.f32 %v1682_v22, %v1676_v12  ;;  %v1684_v25 = vpop.eup %1683 }
 0x308   : > { %v586_v28 = vmul.f32 %v1684_v25, %v1674_v11 }
 0x309   : > { %v588_v26 = vpack.c.bf16 %v585_v24, %v584_v23 }
 0x30a   : > { %v1686_v27 = vpop.eup %1685 }
 0x30b   : > { %v587_v29 = vmul.f32 %v1686_v27, %v1678_v15  ;;  %1572 = vmatmul.mubr.msk.bf16.vlgmr.msra.gmra.mrb[8].mxu1 %vm543_vm3, %v588_v26 }
 0x30c   : > { %1582 = vmatpush3.bf16.msra.mxu1 %v693_v32 }
 0x30d   : > { %v589_v30 = vpack.c.bf16 %v587_v29, %v586_v28  ;;  %1646 = vmatprep.subr.msk.bf16.mxu1 %vm270_vm0, %v1468_v43 }
 0x30f   : > { %1578 = vmatmul.mubr.msk.bf16.vlgmr.msra.gmra.mrb[12].mxu0 %vm543_vm3, %v589_v30 }
 0x310   : > { %1588 = vmatpush3.bf16.msra.mxu0 %v775_v46 }
 0x311   : > { %1647 = vmatprep.subr.msk.bf16.mxu0 %vm270_vm0, %v1469_v47 }
 0x3de   : > { %v627_v33 = vpop.f32.mrb[8].mxu1 }
 0x3df   : > { %v1573_v34 = vpop.f32.mrb[9].mxu1 }
 0x3e0   : > { %v630_v35 = vpop.f32.mrb[10].mxu1 }
 0x3e1   : > { %v678_v36 = vpack.c.bf16 %v630_v35, %v627_v33  ;;  %v1574_v37 = vpop.f32.mrb[11].mxu1 }
 0x3e2   : > { %v671_v38 = vpop.f32.mrb[12].mxu0 }
 0x3e3   : > { %v1579_v39 = vpop.f32.mrb[13].mxu0  ;;  %1583 = vmatprep.mubr.msk.bf16.mxu1 %vm263_vm1, %v678_v36 }
 0x3e4   : > { %v674_v40 = vpop.f32.mrb[14].mxu0 }
 0x3e5   : > { %v679_v41 = vpack.c.bf16 %v674_v40, %v671_v38  ;;  %v1580_v42 = vpop.f32.mrb[15].mxu0 }
 0x3e7   : > { %1584 = vmatmul.mubr.msk.bf16.vlgmr.msra.gmra.mrb[12].mxu1 %vm263_vm1, %v679_v41 }
 0x3e8   : > { %1594 = vmatpush3.bf16.msra.mxu1 %v835_v44 }
 0x3e9   : > { %1605 = vmatprep.subr.bf16.mxu1 %v1711_v8 }
 0x4ba   : > { %v1585_v48 = vpop.f32.mrb[12].mxu1 }
 0x4bb   : > { %v729_v50 = vpop.f32.mrb[13].mxu1  ;;  %v738_v52 = vadd.f32 %v1585_v48, %v1464_v49 }
 0x4bc   : > { %v1586_v51 = vpop.f32.mrb[14].mxu1  ;;  %v730_v55 = vadd.f32 %v1464_v49, %v729_v50 }
 0x4bd   : > { %v741_v53 = vadd.f32 %v1586_v51, %v1464_v49  ;;  %v732_v54 = vpop.f32.mrb[15].mxu1 }
 0x4be   : > { %v733_v56 = vadd.f32 %v1464_v49, %v732_v54 }
 0x4bf   : > { %v745_v57 = vpack.c.bf16 %v741_v53, %v738_v52 }
 0x4c0   : > { %v744_v58 = vpack.c.bf16 %v733_v56, %v730_v55 }
 0x4c2   : > { %1589 = vmatprep.mubr.msk.bf16.mxu0 %vm263_vm1, %v744_v58  ;;  %1595 = vmatprep.mubr.msk.bf16.mxu1 %vm263_vm1, %v744_v58 }
 0x4c3   : > { %1590 = vmatmul.mubr.msk.bf16.vlgmr.msra.gmra.mrb[16].mxu0 %vm263_vm1, %v745_v57  ;;  %1596 = vmatmul.mubr.msk.bf16.vlgmr.msra.gmra.mrb[16].mxu1 %vm263_vm1, %v745_v57 }
 0x4c4   : > { %1601 = vmatprep.mubr.msk.bf16.mxu0 %vm263_vm1, %v744_v58  ;;  %1600 = vmatpush3.bf16.msra.mxu0 %v895_v59 }
 0x4c5   : > { %1611 = vmatprep.subr.bf16.mxu0 %v1711_v8  ;;  %1607 = vmatprep.mubr.msk.bf16.mxu1 %vm1712_vm2, %v1711_v8 }
 0x4cb   : > { %1602 = vmatmul.mubr.msk.bf16.vlgmr.msra.gmra.mrb[20].mxu0 %vm263_vm1, %v745_v57 }
 0x4cc   : > { %1613 = vmatprep.mubr.msk.bf16.mxu0 %vm1712_vm2, %v1711_v8 }
 0x596   : > { %v1591_v60 = vpop.f32.mrb[16].mxu0  ;;  %v1597_v62 = vpop.f32.mrb[16].mxu1 }
 0x597   : > { %v811_v0 = vpop.f32.mrb[17].mxu0  ;;  %v871_v1 = vpop.f32.mrb[17].mxu1  ;;  %v820_v4 = vadd.f32 %v1591_v60, %v1475_v61  ;;  %v880_v5 = vadd.f32 %v1597_v62, %v1478_v63 }
 0x598   : > { %v1592_v2 = vpop.f32.mrb[18].mxu0  ;;  %v1598_v3 = vpop.f32.mrb[18].mxu1  ;;  %v812_v11 = vadd.f32 %v1475_v61, %v811_v0  ;;  %v872_v12 = vadd.f32 %v1478_v63, %v871_v1 }
 0x599   : > { %v823_v6 = vadd.f32 %v1592_v2, %v1475_v61  ;;  %v883_v7 = vadd.f32 %v1598_v3, %v1478_v63  ;;  %v814_v9 = vpop.f32.mrb[19].mxu0  ;;  %v874_v10 = vpop.f32.mrb[19].mxu1 }
 0x59a   : > { %v815_v13 = vadd.f32 %v1475_v61, %v814_v9  ;;  %v875_v14 = vadd.f32 %v1478_v63, %v874_v10 }
 0x59b   : > { %v827_v15 = vpack.c.bf16 %v823_v6, %v820_v4  ;;  %v887_v16 = vpack.c.bf16 %v883_v7, %v880_v5 }
 0x59c   : > { %v826_v17 = vpack.c.bf16 %v815_v13, %v812_v11  ;;  %v886_v18 = vpack.c.bf16 %v875_v14, %v872_v12 }
 0x59d   : > { %v999_v19 = vsel %vm263_vm1, %v887_v16, 0 }
 0x59e   : > { %v1603_v20 = vpop.f32.mrb[20].mxu0  ;;  %1612 = vmatpush3.bf16.xpose.msra.mxu0 %v999_v19  ;;  %v952_v22 = vsel %vm263_vm1, %v886_v18, 0  ;;  %v1470_v19 = vld [vmem:[%s1908_s1 + $0xe] sm:$0x3] }
 0x59f   : > { %v931_v23 = vpop.f32.mrb[21].mxu0  ;;  %1606 = vmatpush3.bf16.xpose.msra.mxu1 %v952_v22  ;;  %1623 = vmatprep.subr.bf16.mxu0 %v1711_v8  ;;  %v940_v25 = vadd.f32 %v1603_v20, %v1481_v21  ;;  %v1195_v20 = vsel %vm270_vm0, %v1470_v19, 0 }
 0x5a0   : > { %v1604_v24 = vpop.f32.mrb[22].mxu0  ;;  %1617 = vmatprep.subr.bf16.mxu1 %v1711_v8  ;;  %v932_v28 = vadd.f32 %v1481_v21, %v931_v23 }
 0x5a1   : > { %v943_v26 = vadd.f32 %v1604_v24, %v1481_v21  ;;  %v934_v27 = vpop.f32.mrb[23].mxu0 }
 0x5a2   : > { %v935_v29 = vadd.f32 %v1481_v21, %v934_v27 }
 0x5a3   : > { %v947_v30 = vpack.c.bf16 %v943_v26, %v940_v25 }
 0x5a4   : > { %v946_v31 = vpack.c.bf16 %v935_v29, %v932_v28 }
 0x5a5   : > { %1614 = vmatmul.mubr.msk.bf16.vlgmr.msra.gmra.mrb[24].mxu0 %vm263_vm1, %v827_v15 }
 0x5a6   : > { %1608 = vmatmul.mubr.msk.bf16.vlgmr.msra.gmra.mrb[20].mxu1 %vm263_vm1, %v826_v17  ;;  %1624 = vmatpush3.bf16.msra.mxu0 %v947_v30  ;;  %v1670_v30 = vld [vmem:[%s1910_s3] sm:$0xff]  }
 0x5a7   : > { %1618 = vmatpush3.bf16.msra.mxu1 %v946_v31  ;;  %1619 = vmatprep.mubr.msk.bf16.mxu1 %vm1712_vm2, %v1711_v8 }
 0x5a8   : > { %1625 = vmatprep.mubr.msk.bf16.mxu0 %vm1712_vm2, %v1711_v8  ;;  %1635 = vmatprep.subr.bf16.mxu0 %v1711_v8 }
 0x5a9   : > { %1648 = vmatprep.subr.msk.bf16.mxu1 %vm270_vm0, %v1470_v19 }
 0x678   : > { %v1035_v32 = vpop.f32.mrb[24].mxu0 }
 0x679   : > { %v988_v33 = vpop.f32.mrb[20].mxu1  ;;  %v1615_v34 = vpop.f32.mrb[25].mxu0  ;;  %v1044_v40 = vmul.f32 0.5, %v1035_v32  ;;  %v1488_v32 = vld [vmem:[%s1909_s2 + $0x7] ss:$0 sm:$0xff] }
 0x67a   : > { %v1042_v35 = vmul.f32 0.5, %v988_v33  ;;  %v1609_v36 = vpop.f32.mrb[21].mxu1  ;;  %v1038_v37 = vpop.f32.mrb[26].mxu0 }
 0x67b   : > { %v991_v38 = vpop.f32.mrb[22].mxu1  ;;  %v1616_v39 = vpop.f32.mrb[27].mxu0  ;;  %v1045_v44 = vmul.f32 0.5, %v1038_v37  ;;  %v1052_v46 = vsel %vm543_vm3, %v1044_v40, -inf }
 0x67c   : > { %v1043_v41 = vmul.f32 0.5, %v991_v38  ;;  %v1610_v42 = vpop.f32.mrb[23].mxu1  ;;  %v1046_v43 = vsel %vm543_vm3, %v1042_v35, -inf }
 0x67d   : > { %1047 = vmax.xlane.f32.xlu0 %v1046_v43  ;;  %v1055_v47 = vsel %vm543_vm3, %v1045_v44, -inf }
 0x67e   : > { %v1049_v45 = vsel %vm543_vm3, %v1043_v41, -inf }
 0x67f   : > { %1050 = vmax.xlane.f32.xlu1 %v1049_v45 }
 0x681   : > { %1053 = vmax.xlane.f32.xlu0 %v1052_v46 }
 0x683   : > { %1056 = vmax.xlane.f32.xlu1 %v1055_v47  ;;  %v1491_v47 = vld [vmem:[%s1911_s4] ss:$0 sm:$0xff] }
 0x70a   : > { %v1048_v48 = vpop.xlane.xlu0 %1047 }
 0x70b   : > { %v1058_v49 = vsub.f32 %v1042_v35, %v1048_v48 }
 0x70c   : > { %v1051_v50 = vpop.xlane.xlu1 %1050 }
 0x70d   : > { %v1062_v51 = vmul.f32 1.442695, %v1058_v49  ;;  %v1059_v52 = vsub.f32 %v1043_v41, %v1051_v50 }
 0x70e   : > { %v1054_v53 = vpop.xlane.xlu0 %1053 }
 0x70f   : > { %1687 = vpow2.f32 %v1062_v51  ;;  %v1064_v54 = vmul.f32 1.442695, %v1059_v52  ;;  %v1060_v55 = vsub.f32 %v1044_v40, %v1054_v53 }
 0x710   : > { %v1057_v56 = vpop.xlane.xlu1 %1056 }
 0x711   : > { %1689 = vpow2.f32 %v1064_v54  ;;  %v1066_v57 = vmul.f32 1.442695, %v1060_v55  ;;  %v1061_v58 = vsub.f32 %v1045_v44, %v1057_v56 }
 0x713   : > { %1691 = vpow2.f32 %v1066_v57  ;;  %v1068_v59 = vmul.f32 1.442695, %v1061_v58 }
 0x715   : > { %1693 = vpow2.f32 %v1068_v59 }
 0x719   : > { %v1688_v60 = vpop.eup %1687 }
 0x71a   : > { %v1070_v61 = vsel %vm543_vm3, %v1688_v60, 0.0 }
 0x71b   : > { %v1690_v62 = vpop.eup %1689  ;;  %1071 = vadd.xlane.f32.xlu0 %v1070_v61 }
 0x71c   : > { %v1073_v63 = vsel %vm543_vm3, %v1690_v62, 0.0 }
 0x71d   : > { %v1692_v0 = vpop.eup %1691  ;;  %1074 = vadd.xlane.f32.xlu1 %v1073_v63 }
 0x71e   : > { %v1076_v1 = vsel %vm543_vm3, %v1692_v0, 0.0 }
 0x71f   : > { %v1694_v2 = vpop.eup %1693  ;;  %1077 = vadd.xlane.f32.xlu0 %v1076_v1 }
 0x720   : > { %v1079_v3 = vsel %vm543_vm3, %v1694_v2, 0.0 }
 0x721   : > { %1080 = vadd.xlane.f32.xlu1 %v1079_v3 }
 0x7a8   : > { %v1072_v4 = vpop.xlane.xlu0 %1071 }
 0x7a9   : > { %1695 = vrcp.f32 %v1072_v4 }
 0x7aa   : > { %v1075_v5 = vpop.xlane.xlu1 %1074 }
 0x7ab   : > { %1697 = vrcp.f32 %v1075_v5 }
 0x7ac   : > { %v1078_v6 = vpop.xlane.xlu0 %1077 }
 0x7ad   : > { %1699 = vrcp.f32 %v1078_v6 }
 0x7ae   : > { %v1081_v7 = vpop.xlane.xlu1 %1080 }
 0x7af   : > { %1701 = vrcp.f32 %v1081_v7 }
 0x7b3   : > { %v1696_v9 = vpop.eup %1695 }
 0x7b4   : > { %v1086_v11 = vmul.f32 %v1696_v9, %v1688_v60 }
 0x7b5   : > { %v1698_v10 = vpop.eup %1697 }
 0x7b6   : > { %v1087_v12 = vmul.f32 %v1698_v10, %v1690_v62 }
 0x7b7   : > { %v1700_v13 = vpop.eup %1699 }
 0x7b8   : > { %v1090_v14 = vpack.c.bf16 %v1087_v12, %v1086_v11  ;;  %v1088_v16 = vmul.f32 %v1700_v13, %v1692_v0 }
 0x7b9   : > { %v1702_v15 = vpop.eup %1701 }
 0x7ba   : > { %v1089_v17 = vmul.f32 %v1702_v15, %v1694_v2  ;;  %1620 = vmatmul.mubr.msk.bf16.vlgmr.msra.gmra.mrb[24].mxu1 %vm543_vm3, %v1090_v14 }
 0x7bb   : > { %1630 = vmatpush3.bf16.msra.mxu1 %v1195_v20 }
 0x7bc   : > { %v1091_v18 = vpack.c.bf16 %v1089_v17, %v1088_v16 }
 0x7be   : > { %1626 = vmatmul.mubr.msk.bf16.vlgmr.msra.gmra.mrb[28].mxu0 %vm543_vm3, %v1091_v18 }
 0x7bf   : > { %1637 = vmatprep.mubr.msk.bf16.mxu0 %vm1712_vm2, %v1711_v8  ;;  %1636 = vmatpush3.bf16.msra.mxu0 %v1670_v30 }
 0x88d   : > { %v1129_v21 = vpop.f32.mrb[24].mxu1 }
 0x88e   : > { %v1621_v22 = vpop.f32.mrb[25].mxu1 }
 0x88f   : > { %v1132_v23 = vpop.f32.mrb[26].mxu1 }
 0x890   : > { %v1180_v24 = vpack.c.bf16 %v1132_v23, %v1129_v21  ;;  %v1622_v25 = vpop.f32.mrb[27].mxu1 }
 0x891   : > { %v1173_v26 = vpop.f32.mrb[28].mxu0 }
 0x892   : > { %v1627_v27 = vpop.f32.mrb[29].mxu0  ;;  %1631 = vmatprep.mubr.msk.bf16.mxu1 %vm263_vm1, %v1180_v24 }
 0x893   : > { %v1176_v28 = vpop.f32.mrb[30].mxu0 }
 0x894   : > { %v1181_v8 = vpack.c.bf16 %v1176_v28, %v1173_v26  ;;  %v1628_v29 = vpop.f32.mrb[31].mxu0 }
 0x896   : > { %1632 = vmatmul.mubr.msk.bf16.vlgmr.msra.gmra.mrb[28].mxu1 %vm263_vm1, %v1181_v8 }
 0x969   : > { %v1633_v31 = vpop.f32.mrb[28].mxu1 }
 0x96a   : > { %v1231_v33 = vpop.f32.mrb[29].mxu1  ;;  %v1240_v35 = vadd.f32 %v1633_v31, %v1488_v32 }
 0x96b   : > { %v1634_v34 = vpop.f32.mrb[30].mxu1  ;;  %v1232_v38 = vadd.f32 %v1488_v32, %v1231_v33 }
 0x96c   : > { %v1243_v36 = vadd.f32 %v1634_v34, %v1488_v32  ;;  %v1234_v37 = vpop.f32.mrb[31].mxu1 }
 0x96d   : > { %v1235_v39 = vadd.f32 %v1488_v32, %v1234_v37  ;;  %v1659_v40 = vpack.i.bf16 %v1240_v35, %v1232_v38 }
 0x96f   : > { %v1661_v41 = vpack.i.bf16 %v1243_v36, %v1235_v39  ;;  %1660 = vxpose.xlu0.b32.start [1/2] (short) (narrow) %v1659_v40, 8 }
 0x973   : > { %1662 = vxpose.xlu0.b32.end [2/2] (short) (narrow) %v1661_v41, 8 }
 0x9ef   : > { %v1663_v42 = vpop.trf.xlu0 }
 0x9f0   : > { %v1667_v43 = vunpack.i.h.bf16 %v1663_v42  ;;  %v1664_v44 = vunpack.i.l.bf16 %v1663_v42 }
 0x9f2   : > { %v1318_v45 = vcombine.low %v1664_v44, %v1667_v43 }
 0x9f4   : > { %v1320_v46 = vpack.c.bf16 %v1318_v45, %v1318_v45 }
 0x9f6   : > { %1638 = vmatmul.mubr.msk.bf16.vlgmr.msra.gmra.mrb[32].mxu0 %vm543_vm3, %v1320_v46 }
 0xac9   : > { %v1373_v48 = vpop.f32.mrb[32].mxu0 }
 0xaca   : > { %v1374_v49 = vadd.f32 %v1491_v47, %v1373_v48  ;;  %v1639_v50 = vpop.f32.mrb[33].mxu0 }
 0xacb   : > { %v1376_v51 = vpop.f32.mrb[34].mxu0 }
 0xacc   : > { %1380 = vst.msk [vmem:[%s227_s16] sm:$0xff] %vm1379_vm4, %v1374_v49  ;;  %v1640_v52 = vpop.f32.mrb[35].mxu0 }
 0xacd PF: > { %s15_s18 = sadd.s32 1, %s1709_s18  }
 0xace   : > { %p12_p5 = scmp.ge.s32.totalorder %s15_s18, 10  }
 0xad0   :  { %14 = sbr.rel (!%p12_p5) target bundleno = 1 (0x1), region = 84 }

// kernel: tpu_custom_call.1
= control target key start
LH: loop header
LB: loop body
LE: loop exit
PB: predicated region body
PF: predicated region fallthrough
CT: control target
= control target key end

     0   :  { %s1743_s18 = smov 0   ;;  %s1907_s0 = inlined_call_operand.vmem [shape: bf16[16,16,4], index: 0, kind: input, shape index: {}]   ;;  %s1908_s1 = inlined_call_operand.vmem [shape: bf16[2,4,4,4], index: 1, kind: input, shape index: {}]   ;;  %s1909_s2 = inlined_call_operand.vmem [shape: f32[2,4,1,4], index: 2, kind: input, shape index: {}]   ;;  %s1910_s3 = inlined_call_operand.vmem [shape: bf16[16,24], index: 3, kind: input, shape index: {}]   ;;  %s1911_s4 = inlined_call_operand.vmem [shape: f32[1,24], index: 4, kind: input, shape index: {}]   ;;  %s1912_s5 = inlined_call_operand.vmem [shape: f32[64,24], index: 5, kind: output, shape index: {}]  }
   0x1 LB: > { %s1749_s19 = sadd.s32 4294967295, %s1709_s18   ;;  %p1438_p0 = scmp.ge.s32.totalorder %s1709_s18, 1  ;;  %s1709_s18 = sphi %s1743_s18, %s15_s18  }
   0x2   : > { %p189_p1 = scmp.lt.s32.totalorder %s1709_s18, 9 }
   0x4   : > { %p190_p2 = pnand %p1438_p0, %p189_p1 }
   0x5   : > { %v1443_v0 = vld [vmem:[%s1908_s1 + $0x2] sm:$0x3] (!%p190_p2)  ;;  %vm270_vm0 = vcmask (!%p190_p2), 1041408   ;;  %s1439_s22 = sshll.u32 (!%p190_p2), %s1749_s19, 1  ;;  %v233_v2 = vld [vmem:[%s1908_s1] sm:$0x3] (!%p190_p2) }
   0x6   : > { %193 = sbr.rel (%p190_p2) target bundleno = 2765 (0xacd), region = 40  ;;  %1642 = vmatprep.subr.msk.bf16.mxu1 (!%p190_p2), %vm270_vm0, %v1443_v0  ;;  %v332_v1 = vsel (!%p190_p2), %vm270_vm0, %v1443_v0, 0  ;;  %p218_p3 = scmp.lt.s32.totalorder (!%p190_p2), %s1439_s22, 15  ;;  %v1444_v3 = vld [vmem:[%s1908_s1 + $0x4] sm:$0x3] (!%p190_p2)  ;;  %1641 = vmatprep.subr.msk.bf16.mxu0 (!%p190_p2), %vm270_vm0, %v233_v2  ;;  %v272_v4 = vsel (!%p190_p2), %vm270_vm0, %v233_v2, 0 }
   0x7   : > { %1546 = vmatpush3.bf16.msra.mxu1 (!%p190_p2), %v332_v1  ;;  %1540 = vmatpush3.bf16.msra.mxu0 (!%p190_p2), %v272_v4  ;;  %vm263_vm1 = vcmask (!%p190_p2), 31744   ;;  %v392_v7 = vsel (!%p190_p2), %vm270_vm0, %v1444_v3, 0  ;;  %v1711_v8 = vmov (!%p190_p2), 0.0   ;;  %vm1712_vm2 = vmmov (!%p190_p2), 0   ;;  %v1449_v9 = vld [vmem:[%s1909_s2] ss:$0 sm:$0xff] (!%p190_p2) }
   0x8   : > { %1643 = vmatprep.subr.msk.bf16.mxu0 (!%p190_p2), %vm270_vm0, %v1444_v3  ;;  %1557 = vmatprep.subr.bf16.mxu1 (!%p190_p2), %v1711_v8  ;;  %v1454_v11 = vld [vmem:[%s1909_s2 + $0x1] ss:$0 sm:$0xff] (!%p190_p2)  ;;  %v1457_v31 = vld [vmem:[%s1909_s2 + $0x2] ss:$0 sm:$0xff] (!%p190_p2)  ;;  %vm543_vm3 = vcmask (!%p190_p2), 130048   ;;  %p224_p4 = scmp.lt.s32.totalorder (!%p190_p2), %s1749_s19, 7 }
   0x9   : > { %vm1379_vm4 = vcmask (!%p190_p2), 195584  }
   0xd   : > { %s1914_s22 = smov (!%p218_p3, %s1439_s22), 15  ;;  %s1916_s19 = smov (!%p224_p4, %s1749_s19), 7 }
   0xe   : > { %s1496_s27 = sshll.u32 %s1914_s22, 3  ;;  %s1442_s11 = sshll.u32 %s1916_s19, 3 }
   0xf   : > { %s222_s30 = scalar_lea.vmem %s1907_s0, %s1496_s27  ;;  %s227_s16 = scalar_lea.vmem %s1912_s5, %s1442_s11 }
  0x10   : > { %v1668_v5 = vld [vmem:[%s222_s30] sm:$0xff]   ;;  %v1669_v6 = vld [vmem:[%s222_s30 + $0x8] sm:$0xff]  }
  0x11   : > { %1547 = vmatprep.mubr.msk.bf16.mxu1 %vm263_vm1, %v1668_v5  ;;  %1541 = vmatprep.mubr.msk.bf16.mxu0 %vm263_vm1, %v1668_v5 }
  0x12   : > { %1548 = vmatmul.mubr.msk.bf16.vlgmr.msra.gmra.mrb[0].mxu1 %vm263_vm1, %v1669_v6  ;;  %1542 = vmatmul.mubr.msk.bf16.vlgmr.msra.gmra.mrb[0].mxu0 %vm263_vm1, %v1669_v6 }
  0x13   : > { %1552 = vmatpush3.bf16.msra.mxu0 %v392_v7  ;;  %1553 = vmatprep.mubr.msk.bf16.mxu0 %vm263_vm1, %v1668_v5 }
  0x14   : > { %1563 = vmatprep.subr.bf16.mxu0 %v1711_v8  ;;  %1559 = vmatprep.mubr.msk.bf16.mxu1 %vm1712_vm2, %v1711_v8 }
  0x1a   : > { %1554 = vmatmul.mubr.msk.bf16.vlgmr.msra.gmra.mrb[4].mxu0 %vm263_vm1, %v1669_v6 }
  0x1b   : > { %1565 = vmatprep.mubr.msk.bf16.mxu0 %vm1712_vm2, %v1711_v8 }
  0xe5   : > { %v1549_v10 = vpop.f32.mrb[0].mxu1  ;;  %v1543_v12 = vpop.f32.mrb[0].mxu0 }
  0xe6   : > { %v368_v13 = vpop.f32.mrb[1].mxu1  ;;  %v317_v14 = vadd.f32 %v1543_v12, %v1449_v9  ;;  %v308_v15 = vpop.f32.mrb[1].mxu0  ;;  %v377_v19 = vadd.f32 %v1549_v10, %v1454_v11 }
  0xe7   : > { %v1550_v16 = vpop.f32.mrb[2].mxu1  ;;  %v309_v17 = vadd.f32 %v1449_v9, %v308_v15  ;;  %v1544_v18 = vpop.f32.mrb[2].mxu0  ;;  %v369_v24 = vadd.f32 %v1454_v11, %v368_v13 }
  0xe8   : > { %v380_v20 = vadd.f32 %v1550_v16, %v1454_v11  ;;  %v371_v21 = vpop.f32.mrb[3].mxu1  ;;  %v320_v22 = vadd.f32 %v1544_v18, %v1449_v9  ;;  %v311_v23 = vpop.f32.mrb[3].mxu0 }
  0xe9   : > { %v372_v25 = vadd.f32 %v1454_v11, %v371_v21  ;;  %v312_v26 = vadd.f32 %v1449_v9, %v311_v23 }
  0xea   : > { %v384_v27 = vpack.c.bf16 %v380_v20, %v377_v19  ;;  %v324_v28 = vpack.c.bf16 %v320_v22, %v317_v14 }
  0xeb   : > { %v383_v29 = vpack.c.bf16 %v372_v25, %v369_v24  ;;  %v323_v30 = vpack.c.bf16 %v312_v26, %v309_v17 }
  0xec   : > { %v496_v32 = vsel %vm263_vm1, %v384_v27, 0 }
  0xed   : > { %1564 = vmatpush3.bf16.xpose.msra.mxu0 %v496_v32  ;;  %v449_v33 = vsel %vm263_vm1, %v383_v29, 0  ;;  %v1555_v34 = vpop.f32.mrb[4].mxu0 }
  0xee   : > { %1558 = vmatpush3.bf16.xpose.msra.mxu1 %v449_v33  ;;  %v437_v35 = vadd.f32 %v1555_v34, %v1457_v31  ;;  %v428_v36 = vpop.f32.mrb[5].mxu0  ;;  %1575 = vmatprep.subr.bf16.mxu0 %v1711_v8 }
  0xef   : > { %v429_v37 = vadd.f32 %v1457_v31, %v428_v36  ;;  %v1556_v38 = vpop.f32.mrb[6].mxu0  ;;  %1569 = vmatprep.subr.bf16.mxu1 %v1711_v8 }
  0xf0   : > { %v440_v39 = vadd.f32 %v1556_v38, %v1457_v31  ;;  %v431_v40 = vpop.f32.mrb[7].mxu0 }
  0xf1   : > { %v432_v41 = vadd.f32 %v1457_v31, %v431_v40  ;;  %v1445_v31 = vld [vmem:[%s1908_s1 + $0x6] sm:$0x3] }
  0xf2   : > { %v444_v42 = vpack.c.bf16 %v440_v39, %v437_v35  ;;  %v693_v32 = vsel %vm270_vm0, %v1445_v31, 0 }
  0xf3   : > { %v443_v43 = vpack.c.bf16 %v432_v41, %v429_v37 }
  0xf4   : > { %1566 = vmatmul.mubr.msk.bf16.vlgmr.msra.gmra.mrb[8].mxu0 %vm263_vm1, %v324_v28 }
  0xf5   : > { %1560 = vmatmul.mubr.msk.bf16.vlgmr.msra.gmra.mrb[4].mxu1 %vm263_vm1, %v323_v30  ;;  %1576 = vmatpush3.bf16.msra.mxu0 %v444_v42 }
  0xf6   : > { %1570 = vmatpush3.bf16.msra.mxu1 %v443_v43  ;;  %1571 = vmatprep.mubr.msk.bf16.mxu1 %vm1712_vm2, %v1711_v8  ;;  %v1468_v43 = vld [vmem:[%s1908_s1 + $0xa] sm:$0x3] }
  0xf7   : > { %1577 = vmatprep.mubr.msk.bf16.mxu0 %vm1712_vm2, %v1711_v8  ;;  %1644 = vmatprep.subr.msk.bf16.mxu1 %vm270_vm0, %v1445_v31 }
 0x1c7   : > { %v532_v44 = vpop.f32.mrb[8].mxu0 }
 0x1c8   : > { %v541_v45 = vmul.f32 0.5, %v532_v44  ;;  %v485_v46 = vpop.f32.mrb[4].mxu1  ;;  %v1567_v47 = vpop.f32.mrb[9].mxu0  ;;  %v835_v44 = vsel %vm270_vm0, %v1468_v43, 0 }
 0x1c9   : > { %v539_v48 = vmul.f32 0.5, %v485_v46  ;;  %v1561_v49 = vpop.f32.mrb[5].mxu1  ;;  %v535_v50 = vpop.f32.mrb[10].mxu0  ;;  %v1469_v47 = vld [vmem:[%s1908_s1 + $0xc] sm:$0x3] }
 0x1ca   : > { %v542_v51 = vmul.f32 0.5, %v535_v50  ;;  %v488_v52 = vpop.f32.mrb[6].mxu1  ;;  %v1568_v53 = vpop.f32.mrb[11].mxu0  ;;  %v550_v54 = vsel %vm543_vm3, %v541_v45, -inf  ;;  %v1464_v49 = vld [vmem:[%s1909_s2 + $0x3] ss:$0 sm:$0xff] }
 0x1cb   : > { %v540_v55 = vmul.f32 0.5, %v488_v52  ;;  %551 = vmax.xlane.f32.xlu1 %v550_v54  ;;  %v1562_v56 = vpop.f32.mrb[7].mxu1  ;;  %v544_v57 = vsel %vm543_vm3, %v539_v48, -inf }
 0x1cc   : > { %545 = vmax.xlane.f32.xlu0 %v544_v57  ;;  %v553_v58 = vsel %vm543_vm3, %v542_v51, -inf }
 0x1cd   : > { %v547_v59 = vsel %vm543_vm3, %v540_v55, -inf }
 0x1cf   : > { %554 = vmax.xlane.f32.xlu1 %v553_v58 }
 0x1d0   : > { %548 = vmax.xlane.f32.xlu0 %v547_v59  ;;  %v895_v59 = vsel %vm270_vm0, %v1469_v47, 0 }
 0x258   : > { %v552_v60 = vpop.xlane.xlu1 %551 }
 0x259   : > { %v558_v61 = vsub.f32 %v541_v45, %v552_v60  ;;  %v546_v62 = vpop.xlane.xlu0 %545  ;;  %v1467_v45 = vld [vmem:[%s1908_s1 + $0x8] sm:$0x3] }
 0x25a   : > { %v556_v63 = vsub.f32 %v539_v48, %v546_v62  ;;  %1645 = vmatprep.subr.msk.bf16.mxu0 %vm270_vm0, %v1467_v45  ;;  %v775_v46 = vsel %vm270_vm0, %v1467_v45, 0 }
 0x25b   : > { %v564_v0 = vmul.f32 1.442695, %v558_v61  ;;  %v1475_v61 = vld [vmem:[%s1909_s2 + $0x4] ss:$0 sm:$0xff] }
 0x25c   : > { %v560_v1 = vmul.f32 1.442695, %v556_v63  ;;  %v555_v2 = vpop.xlane.xlu1 %554  ;;  %v1478_v63 = vld [vmem:[%s1909_s2 + $0x5] ss:$0 sm:$0xff] }
 0x25d   : > { %v559_v3 = vsub.f32 %v542_v51, %v555_v2  ;;  %v549_v4 = vpop.xlane.xlu0 %548 }
 0x25e   : > { %1671 = vpow2.f32 %v560_v1  ;;  %v557_v5 = vsub.f32 %v540_v55, %v549_v4 }
 0x25f   : > { %1673 = vpow2.f32 %v564_v0  ;;  %v566_v6 = vmul.f32 1.442695, %v559_v3 }
 0x260   : > { %v562_v7 = vmul.f32 1.442695, %v557_v5 }
 0x262   : > { %1675 = vpow2.f32 %v562_v7 }
 0x263   : > { %1677 = vpow2.f32 %v566_v6 }
 0x268   : > { %v1672_v9 = vpop.eup %1671 }
 0x269   : > { %v568_v10 = vsel %vm543_vm3, %v1672_v9, 0.0  ;;  %v1674_v11 = vpop.eup %1673 }
 0x26a   : > { %569 = vadd.xlane.f32.xlu0 %v568_v10  ;;  %v574_v13 = vsel %vm543_vm3, %v1674_v11, 0.0 }
 0x26c   : > { %v1676_v12 = vpop.eup %1675 }
 0x26d   : > { %v571_v14 = vsel %vm543_vm3, %v1676_v12, 0.0  ;;  %v1678_v15 = vpop.eup %1677 }
 0x26e   : > { %575 = vadd.xlane.f32.xlu0 %v574_v13  ;;  %572 = vadd.xlane.f32.xlu1 %v571_v14  ;;  %v577_v16 = vsel %vm543_vm3, %v1678_v15, 0.0 }
 0x272   : > { %578 = vadd.xlane.f32.xlu1 %v577_v16 }
 0x2f7   : > { %v570_v17 = vpop.xlane.xlu0 %569 }
 0x2f8   : > { %1679 = vrcp.f32 %v570_v17 }
 0x2fb   : > { %v573_v18 = vpop.xlane.xlu1 %572  ;;  %v576_v19 = vpop.xlane.xlu0 %575 }
 0x2fc   : > { %1681 = vrcp.f32 %v573_v18 }
 0x2fd   : > { %1683 = vrcp.f32 %v576_v19 }
 0x2ff   : > { %v579_v20 = vpop.xlane.xlu1 %578 }
 0x300   : > { %1685 = vrcp.f32 %v579_v20 }
 0x302   : > { %v1680_v21 = vpop.eup %1679 }
 0x303   : > { %v584_v23 = vmul.f32 %v1680_v21, %v1672_v9  ;;  %v1481_v21 = vld [vmem:[%s1909_s2 + $0x6] ss:$0 sm:$0xff] }
 0x306   : > { %v1682_v22 = vpop.eup %1681 }
 0x307   : > { %v585_v24 = vmul.f32 %v1682_v22, %v1676_v12  ;;  %v1684_v25 = vpop.eup %1683 }
 0x308   : > { %v586_v28 = vmul.f32 %v1684_v25, %v1674_v11 }
 0x309   : > { %v588_v26 = vpack.c.bf16 %v585_v24, %v584_v23 }
 0x30a   : > { %v1686_v27 = vpop.eup %1685 }
 0x30b   : > { %v587_v29 = vmul.f32 %v1686_v27, %v1678_v15  ;;  %1572 = vmatmul.mubr.msk.bf16.vlgmr.msra.gmra.mrb[8].mxu1 %vm543_vm3, %v588_v26 }
 0x30c   : > { %1582 = vmatpush3.bf16.msra.mxu1 %v693_v32 }
 0x30d   : > { %v589_v30 = vpack.c.bf16 %v587_v29, %v586_v28  ;;  %1646 = vmatprep.subr.msk.bf16.mxu1 %vm270_vm0, %v1468_v43 }
 0x30f   : > { %1578 = vmatmul.mubr.msk.bf16.vlgmr.msra.gmra.mrb[12].mxu0 %vm543_vm3, %v589_v30 }
 0x310   : > { %1588 = vmatpush3.bf16.msra.mxu0 %v775_v46 }
 0x311   : > { %1647 = vmatprep.subr.msk.bf16.mxu0 %vm270_vm0, %v1469_v47 }
 0x3de   : > { %v627_v33 = vpop.f32.mrb[8].mxu1 }
 0x3df   : > { %v1573_v34 = vpop.f32.mrb[9].mxu1 }
 0x3e0   : > { %v630_v35 = vpop.f32.mrb[10].mxu1 }
 0x3e1   : > { %v678_v36 = vpack.c.bf16 %v630_v35, %v627_v33  ;;  %v1574_v37 = vpop.f32.mrb[11].mxu1 }
 0x3e2   : > { %v671_v38 = vpop.f32.mrb[12].mxu0 }
 0x3e3   : > { %v1579_v39 = vpop.f32.mrb[13].mxu0  ;;  %1583 = vmatprep.mubr.msk.bf16.mxu1 %vm263_vm1, %v678_v36 }
 0x3e4   : > { %v674_v40 = vpop.f32.mrb[14].mxu0 }
 0x3e5   : > { %v679_v41 = vpack.c.bf16 %v674_v40, %v671_v38  ;;  %v1580_v42 = vpop.f32.mrb[15].mxu0 }
 0x3e7   : > { %1584 = vmatmul.mubr.msk.bf16.vlgmr.msra.gmra.mrb[12].mxu1 %vm263_vm1, %v679_v41 }
 0x3e8   : > { %1594 = vmatpush3.bf16.msra.mxu1 %v835_v44 }
 0x3e9   : > { %1605 = vmatprep.subr.bf16.mxu1 %v1711_v8 }
 0x4ba   : > { %v1585_v48 = vpop.f32.mrb[12].mxu1 }
 0x4bb   : > { %v729_v50 = vpop.f32.mrb[13].mxu1  ;;  %v738_v52 = vadd.f32 %v1585_v48, %v1464_v49 }
 0x4bc   : > { %v1586_v51 = vpop.f32.mrb[14].mxu1  ;;  %v730_v55 = vadd.f32 %v1464_v49, %v729_v50 }
 0x4bd   : > { %v741_v53 = vadd.f32 %v1586_v51, %v1464_v49  ;;  %v732_v54 = vpop.f32.mrb[15].mxu1 }
 0x4be   : > { %v733_v56 = vadd.f32 %v1464_v49, %v732_v54 }
 0x4bf   : > { %v745_v57 = vpack.c.bf16 %v741_v53, %v738_v52 }
 0x4c0   : > { %v744_v58 = vpack.c.bf16 %v733_v56, %v730_v55 }
 0x4c2   : > { %1589 = vmatprep.mubr.msk.bf16.mxu0 %vm263_vm1, %v744_v58  ;;  %1595 = vmatprep.mubr.msk.bf16.mxu1 %vm263_vm1, %v744_v58 }
 0x4c3   : > { %1590 = vmatmul.mubr.msk.bf16.vlgmr.msra.gmra.mrb[16].mxu0 %vm263_vm1, %v745_v57  ;;  %1596 = vmatmul.mubr.msk.bf16.vlgmr.msra.gmra.mrb[16].mxu1 %vm263_vm1, %v745_v57 }
 0x4c4   : > { %1601 = vmatprep.mubr.msk.bf16.mxu0 %vm263_vm1, %v744_v58  ;;  %1600 = vmatpush3.bf16.msra.mxu0 %v895_v59 }
 0x4c5   : > { %1611 = vmatprep.subr.bf16.mxu0 %v1711_v8  ;;  %1607 = vmatprep.mubr.msk.bf16.mxu1 %vm1712_vm2, %v1711_v8 }
 0x4cb   : > { %1602 = vmatmul.mubr.msk.bf16.vlgmr.msra.gmra.mrb[20].mxu0 %vm263_vm1, %v745_v57 }
 0x4cc   : > { %1613 = vmatprep.mubr.msk.bf16.mxu0 %vm1712_vm2, %v1711_v8 }
 0x596   : > { %v1591_v60 = vpop.f32.mrb[16].mxu0  ;;  %v1597_v62 = vpop.f32.mrb[16].mxu1 }
 0x597   : > { %v811_v0 = vpop.f32.mrb[17].mxu0  ;;  %v871_v1 = vpop.f32.mrb[17].mxu1  ;;  %v820_v4 = vadd.f32 %v1591_v60, %v1475_v61  ;;  %v880_v5 = vadd.f32 %v1597_v62, %v1478_v63 }
 0x598   : > { %v1592_v2 = vpop.f32.mrb[18].mxu0  ;;  %v1598_v3 = vpop.f32.mrb[18].mxu1  ;;  %v812_v11 = vadd.f32 %v1475_v61, %v811_v0  ;;  %v872_v12 = vadd.f32 %v1478_v63, %v871_v1 }
 0x599   : > { %v823_v6 = vadd.f32 %v1592_v2, %v1475_v61  ;;  %v883_v7 = vadd.f32 %v1598_v3, %v1478_v63  ;;  %v814_v9 = vpop.f32.mrb[19].mxu0  ;;  %v874_v10 = vpop.f32.mrb[19].mxu1 }
 0x59a   : > { %v815_v13 = vadd.f32 %v1475_v61, %v814_v9  ;;  %v875_v14 = vadd.f32 %v1478_v63, %v874_v10 }
 0x59b   : > { %v827_v15 = vpack.c.bf16 %v823_v6, %v820_v4  ;;  %v887_v16 = vpack.c.bf16 %v883_v7, %v880_v5 }
 0x59c   : > { %v826_v17 = vpack.c.bf16 %v815_v13, %v812_v11  ;;  %v886_v18 = vpack.c.bf16 %v875_v14, %v872_v12 }
 0x59d   : > { %v999_v19 = vsel %vm263_vm1, %v887_v16, 0 }
 0x59e   : > { %v1603_v20 = vpop.f32.mrb[20].mxu0  ;;  %1612 = vmatpush3.bf16.xpose.msra.mxu0 %v999_v19  ;;  %v952_v22 = vsel %vm263_vm1, %v886_v18, 0  ;;  %v1470_v19 = vld [vmem:[%s1908_s1 + $0xe] sm:$0x3] }
 0x59f   : > { %v931_v23 = vpop.f32.mrb[21].mxu0  ;;  %1606 = vmatpush3.bf16.xpose.msra.mxu1 %v952_v22  ;;  %1623 = vmatprep.subr.bf16.mxu0 %v1711_v8  ;;  %v940_v25 = vadd.f32 %v1603_v20, %v1481_v21  ;;  %v1195_v20 = vsel %vm270_vm0, %v1470_v19, 0 }
 0x5a0   : > { %v1604_v24 = vpop.f32.mrb[22].mxu0  ;;  %1617 = vmatprep.subr.bf16.mxu1 %v1711_v8  ;;  %v932_v28 = vadd.f32 %v1481_v21, %v931_v23 }
 0x5a1   : > { %v943_v26 = vadd.f32 %v1604_v24, %v1481_v21  ;;  %v934_v27 = vpop.f32.mrb[23].mxu0 }
 0x5a2   : > { %v935_v29 = vadd.f32 %v1481_v21, %v934_v27 }
 0x5a3   : > { %v947_v30 = vpack.c.bf16 %v943_v26, %v940_v25 }
 0x5a4   : > { %v946_v31 = vpack.c.bf16 %v935_v29, %v932_v28 }
 0x5a5   : > { %1614 = vmatmul.mubr.msk.bf16.vlgmr.msra.gmra.mrb[24].mxu0 %vm263_vm1, %v827_v15 }
 0x5a6   : > { %1608 = vmatmul.mubr.msk.bf16.vlgmr.msra.gmra.mrb[20].mxu1 %vm263_vm1, %v826_v17  ;;  %1624 = vmatpush3.bf16.msra.mxu0 %v947_v30  ;;  %v1670_v30 = vld [vmem:[%s1910_s3] sm:$0xff]  }
 0x5a7   : > { %1618 = vmatpush3.bf16.msra.mxu1 %v946_v31  ;;  %1619 = vmatprep.mubr.msk.bf16.mxu1 %vm1712_vm2, %v1711_v8 }
 0x5a8   : > { %1625 = vmatprep.mubr.msk.bf16.mxu0 %vm1712_vm2, %v1711_v8  ;;  %1635 = vmatprep.subr.bf16.mxu0 %v1711_v8 }
 0x5a9   : > { %1648 = vmatprep.subr.msk.bf16.mxu1 %vm270_vm0, %v1470_v19 }
 0x678   : > { %v1035_v32 = vpop.f32.mrb[24].mxu0 }
 0x679   : > { %v988_v33 = vpop.f32.mrb[20].mxu1  ;;  %v1615_v34 = vpop.f32.mrb[25].mxu0  ;;  %v1044_v40 = vmul.f32 0.5, %v1035_v32  ;;  %v1488_v32 = vld [vmem:[%s1909_s2 + $0x7] ss:$0 sm:$0xff] }
 0x67a   : > { %v1042_v35 = vmul.f32 0.5, %v988_v33  ;;  %v1609_v36 = vpop.f32.mrb[21].mxu1  ;;  %v1038_v37 = vpop.f32.mrb[26].mxu0 }
 0x67b   : > { %v991_v38 = vpop.f32.mrb[22].mxu1  ;;  %v1616_v39 = vpop.f32.mrb[27].mxu0  ;;  %v1045_v44 = vmul.f32 0.5, %v1038_v37  ;;  %v1052_v46 = vsel %vm543_vm3, %v1044_v40, -inf }
 0x67c   : > { %v1043_v41 = vmul.f32 0.5, %v991_v38  ;;  %v1610_v42 = vpop.f32.mrb[23].mxu1  ;;  %v1046_v43 = vsel %vm543_vm3, %v1042_v35, -inf }
 0x67d   : > { %1047 = vmax.xlane.f32.xlu0 %v1046_v43  ;;  %v1055_v47 = vsel %vm543_vm3, %v1045_v44, -inf }
 0x67e   : > { %v1049_v45 = vsel %vm543_vm3, %v1043_v41, -inf }
 0x67f   : > { %1050 = vmax.xlane.f32.xlu1 %v1049_v45 }
 0x681   : > { %1053 = vmax.xlane.f32.xlu0 %v1052_v46 }
 0x683   : > { %1056 = vmax.xlane.f32.xlu1 %v1055_v47  ;;  %v1491_v47 = vld [vmem:[%s1911_s4] ss:$0 sm:$0xff] }
 0x70a   : > { %v1048_v48 = vpop.xlane.xlu0 %1047 }
 0x70b   : > { %v1058_v49 = vsub.f32 %v1042_v35, %v1048_v48 }
 0x70c   : > { %v1051_v50 = vpop.xlane.xlu1 %1050 }
 0x70d   : > { %v1062_v51 = vmul.f32 1.442695, %v1058_v49  ;;  %v1059_v52 = vsub.f32 %v1043_v41, %v1051_v50 }
 0x70e   : > { %v1054_v53 = vpop.xlane.xlu0 %1053 }
 0x70f   : > { %1687 = vpow2.f32 %v1062_v51  ;;  %v1064_v54 = vmul.f32 1.442695, %v1059_v52  ;;  %v1060_v55 = vsub.f32 %v1044_v40, %v1054_v53 }
 0x710   : > { %v1057_v56 = vpop.xlane.xlu1 %1056 }
 0x711   : > { %1689 = vpow2.f32 %v1064_v54  ;;  %v1066_v57 = vmul.f32 1.442695, %v1060_v55  ;;  %v1061_v58 = vsub.f32 %v1045_v44, %v1057_v56 }
 0x713   : > { %1691 = vpow2.f32 %v1066_v57  ;;  %v1068_v59 = vmul.f32 1.442695, %v1061_v58 }
 0x715   : > { %1693 = vpow2.f32 %v1068_v59 }
 0x719   : > { %v1688_v60 = vpop.eup %1687 }
 0x71a   : > { %v1070_v61 = vsel %vm543_vm3, %v1688_v60, 0.0 }
 0x71b   : > { %v1690_v62 = vpop.eup %1689  ;;  %1071 = vadd.xlane.f32.xlu0 %v1070_v61 }
 0x71c   : > { %v1073_v63 = vsel %vm543_vm3, %v1690_v62, 0.0 }
 0x71d   : > { %v1692_v0 = vpop.eup %1691  ;;  %1074 = vadd.xlane.f32.xlu1 %v1073_v63 }
 0x71e   : > { %v1076_v1 = vsel %vm543_vm3, %v1692_v0, 0.0 }
 0x71f   : > { %v1694_v2 = vpop.eup %1693  ;;  %1077 = vadd.xlane.f32.xlu0 %v1076_v1 }
 0x720   : > { %v1079_v3 = vsel %vm543_vm3, %v1694_v2, 0.0 }
 0x721   : > { %1080 = vadd.xlane.f32.xlu1 %v1079_v3 }
 0x7a8   : > { %v1072_v4 = vpop.xlane.xlu0 %1071 }
 0x7a9   : > { %1695 = vrcp.f32 %v1072_v4 }
 0x7aa   : > { %v1075_v5 = vpop.xlane.xlu1 %1074 }
 0x7ab   : > { %1697 = vrcp.f32 %v1075_v5 }
 0x7ac   : > { %v1078_v6 = vpop.xlane.xlu0 %1077 }
 0x7ad   : > { %1699 = vrcp.f32 %v1078_v6 }
 0x7ae   : > { %v1081_v7 = vpop.xlane.xlu1 %1080 }
 0x7af   : > { %1701 = vrcp.f32 %v1081_v7 }
 0x7b3   : > { %v1696_v9 = vpop.eup %1695 }
 0x7b4   : > { %v1086_v11 = vmul.f32 %v1696_v9, %v1688_v60 }
 0x7b5   : > { %v1698_v10 = vpop.eup %1697 }
 0x7b6   : > { %v1087_v12 = vmul.f32 %v1698_v10, %v1690_v62 }
 0x7b7   : > { %v1700_v13 = vpop.eup %1699 }
 0x7b8   : > { %v1090_v14 = vpack.c.bf16 %v1087_v12, %v1086_v11  ;;  %v1088_v16 = vmul.f32 %v1700_v13, %v1692_v0 }
 0x7b9   : > { %v1702_v15 = vpop.eup %1701 }
 0x7ba   : > { %v1089_v17 = vmul.f32 %v1702_v15, %v1694_v2  ;;  %1620 = vmatmul.mubr.msk.bf16.vlgmr.msra.gmra.mrb[24].mxu1 %vm543_vm3, %v1090_v14 }
 0x7bb   : > { %1630 = vmatpush3.bf16.msra.mxu1 %v1195_v20 }
 0x7bc   : > { %v1091_v18 = vpack.c.bf16 %v1089_v17, %v1088_v16 }
 0x7be   : > { %1626 = vmatmul.mubr.msk.bf16.vlgmr.msra.gmra.mrb[28].mxu0 %vm543_vm3, %v1091_v18 }
 0x7bf   : > { %1637 = vmatprep.mubr.msk.bf16.mxu0 %vm1712_vm2, %v1711_v8  ;;  %1636 = vmatpush3.bf16.msra.mxu0 %v1670_v30 }
 0x88d   : > { %v1129_v21 = vpop.f32.mrb[24].mxu1 }
 0x88e   : > { %v1621_v22 = vpop.f32.mrb[25].mxu1 }
 0x88f   : > { %v1132_v23 = vpop.f32.mrb[26].mxu1 }
 0x890   : > { %v1180_v24 = vpack.c.bf16 %v1132_v23, %v1129_v21  ;;  %v1622_v25 = vpop.f32.mrb[27].mxu1 }
 0x891   : > { %v1173_v26 = vpop.f32.mrb[28].mxu0 }
 0x892   : > { %v1627_v27 = vpop.f32.mrb[29].mxu0  ;;  %1631 = vmatprep.mubr.msk.bf16.mxu1 %vm263_vm1, %v1180_v24 }
 0x893   : > { %v1176_v28 = vpop.f32.mrb[30].mxu0 }
 0x894   : > { %v1181_v8 = vpack.c.bf16 %v1176_v28, %v1173_v26  ;;  %v1628_v29 = vpop.f32.mrb[31].mxu0 }
 0x896   : > { %1632 = vmatmul.mubr.msk.bf16.vlgmr.msra.gmra.mrb[28].mxu1 %vm263_vm1, %v1181_v8 }
 0x969   : > { %v1633_v31 = vpop.f32.mrb[28].mxu1 }
 0x96a   : > { %v1231_v33 = vpop.f32.mrb[29].mxu1  ;;  %v1240_v35 = vadd.f32 %v1633_v31, %v1488_v32 }
 0x96b   : > { %v1634_v34 = vpop.f32.mrb[30].mxu1  ;;  %v1232_v38 = vadd.f32 %v1488_v32, %v1231_v33 }
 0x96c   : > { %v1243_v36 = vadd.f32 %v1634_v34, %v1488_v32  ;;  %v1234_v37 = vpop.f32.mrb[31].mxu1 }
 0x96d   : > { %v1235_v39 = vadd.f32 %v1488_v32, %v1234_v37  ;;  %v1659_v40 = vpack.i.bf16 %v1240_v35, %v1232_v38 }
 0x96f   : > { %v1661_v41 = vpack.i.bf16 %v1243_v36, %v1235_v39  ;;  %1660 = vxpose.xlu0.b32.start [1/2] (short) (narrow) %v1659_v40, 8 }
 0x973   : > { %1662 = vxpose.xlu0.b32.end [2/2] (short) (narrow) %v1661_v41, 8 }
 0x9ef   : > { %v1663_v42 = vpop.trf.xlu0 }
 0x9f0   : > { %v1667_v43 = vunpack.i.h.bf16 %v1663_v42  ;;  %v1664_v44 = vunpack.i.l.bf16 %v1663_v42 }
 0x9f2   : > { %v1318_v45 = vcombine.low %v1664_v44, %v1667_v43 }
 0x9f4   : > { %v1320_v46 = vpack.c.bf16 %v1318_v45, %v1318_v45 }
 0x9f6   : > { %1638 = vmatmul.mubr.msk.bf16.vlgmr.msra.gmra.mrb[32].mxu0 %vm543_vm3, %v1320_v46 }
 0xac9   : > { %v1373_v48 = vpop.f32.mrb[32].mxu0 }
 0xaca   : > { %v1374_v49 = vadd.f32 %v1491_v47, %v1373_v48  ;;  %v1639_v50 = vpop.f32.mrb[33].mxu0 }
 0xacb   : > { %v1376_v51 = vpop.f32.mrb[34].mxu0 }
 0xacc   : > { %1380 = vst.msk [vmem:[%s227_s16] sm:$0xff] %vm1379_vm4, %v1374_v49  ;;  %v1640_v52 = vpop.f32.mrb[35].mxu0 }
 0xacd PF: > { %s15_s18 = sadd.s32 1, %s1709_s18  }
 0xace   : > { %p12_p5 = scmp.ge.s32.totalorder %s15_s18, 10  }
 0xad0   :  { %14 = sbr.rel (!%p12_p5) target bundleno = 1 (0x1), region = 84 }

</bundles_post_ra>
